<compile_context>
chip_gen: v6e
topology: v6e:2x2x1
jax: 0.10.0
libtpu: 0.0.40
codegen_flags: <defaults>
</compile_context>

<pallas_src>
import functools

import jax
import jax.numpy as jnp
from jax import lax
from jax.experimental import pallas as pl
from jax.experimental.pallas import tpu as pltpu


# ----------------------------------------------------------------------------
# shared in-kernel GRU cell (PyTorch semantics), stacked-gate weights
#   w_ih: (nin, 3H) bf16, w_hh: (H, 3H) bf16, b_ih/b_hh: (1, 3H) f32
#   gate column order: [r | z | n]
# ----------------------------------------------------------------------------
def _gru_cell(x, h, w_ih, w_hh, b_ih, b_hh, nhid):
    gi = jnp.dot(x.astype(w_ih.dtype), w_ih,
                 preferred_element_type=jnp.float32) + b_ih
    gh = jnp.dot(h.astype(w_hh.dtype), w_hh,
                 preferred_element_type=jnp.float32) + b_hh
    r = jax.nn.sigmoid(gi[:, :nhid] + gh[:, :nhid])
    z = jax.nn.sigmoid(gi[:, nhid:2 * nhid] + gh[:, nhid:2 * nhid])
    n = jnp.tanh(gi[:, 2 * nhid:] + r * gh[:, 2 * nhid:])
    return (1.0 - z) * n + z * h


# ----------------------------------------------------------------------------
# Fused bidirectional encoder GRU.  grid=(S,), both directions per step.
# ----------------------------------------------------------------------------
def _bigru_kernel(xf_ref, xb_ref, m_ref,
                  wih_f_ref, whh_f_ref, bih_f_ref, bhh_f_ref,
                  wih_b_ref, whh_b_ref, bih_b_ref, bhh_b_ref,
                  of_ref, ob_ref, hf_scr, hb_scr):
    t = pl.program_id(0)
    S = m_ref.shape[0]
    H = hf_scr.shape[-1]

    @pl.when(t == 0)
    def _():
        hf_scr[...] = jnp.zeros(hf_scr.shape, hf_scr.dtype)
        hb_scr[...] = jnp.zeros(hb_scr.shape, hb_scr.dtype)

    # ---- forward direction: timestep t ----
    xf = xf_ref[0]                       # (B, ninp)
    mf = m_ref[t]                        # (B, 1)   1.0 valid / 0.0 pad
    hf_prev = hf_scr[...]
    hf_new = _gru_cell(xf, hf_prev, wih_f_ref[...], whh_f_ref[...],
                       bih_f_ref[...], bhh_f_ref[...], H)
    of_ref[0] = mf * hf_new                                  # pad -> 0 output
    hf_scr[...] = mf * hf_new + (1.0 - mf) * hf_prev         # pad -> keep hidden

    # ---- backward direction: timestep S-1-t ----
    xb = xb_ref[0]
    mb = m_ref[S - 1 - t]
    hb_prev = hb_scr[...]
    hb_new = _gru_cell(xb, hb_prev, wih_b_ref[...], whh_b_ref[...],
                       bih_b_ref[...], bhh_b_ref[...], H)
    ob_ref[0] = mb * hb_new
    hb_scr[...] = mb * hb_new + (1.0 - mb) * hb_prev


def bigru_encode(pp, x_tm, m_tm):
    S, B, ninp = x_tm.shape
    H = pp['enc_f_whh'].shape[0]

    def full(x):
        nd = x.ndim
        return pl.BlockSpec(x.shape, lambda *_, nd=nd: (0,) * nd)

    weights = [pp['enc_f_wih'], pp['enc_f_whh'], pp['enc_f_bih'], pp['enc_f_bhh'],
               pp['enc_b_wih'], pp['enc_b_whh'], pp['enc_b_bih'], pp['enc_b_bhh']]

    fwd, bwd = pl.pallas_call(
        _bigru_kernel,
        grid=(S,),
        in_specs=([pl.BlockSpec((1, B, ninp), lambda t: (t, 0, 0)),          # fwd x
                   pl.BlockSpec((1, B, ninp), lambda t: (S - 1 - t, 0, 0)),  # bwd x
                   full(m_tm)]                                               # mask (resident)
                  + [full(w) for w in weights]),
        out_specs=[pl.BlockSpec((1, B, H), lambda t: (t, 0, 0)),
                   pl.BlockSpec((1, B, H), lambda t: (S - 1 - t, 0, 0))],
        out_shape=[jax.ShapeDtypeStruct((S, B, H), jnp.float32),
                   jax.ShapeDtypeStruct((S, B, H), jnp.float32)],
        scratch_shapes=[pltpu.VMEM((B, H), jnp.float32),
                        pltpu.VMEM((B, H), jnp.float32)],
        compiler_params=pltpu.CompilerParams(
            dimension_semantics=("arbitrary",)),
    )(x_tm, x_tm, m_tm, *weights)
    return fwd, bwd


# ----------------------------------------------------------------------------
# Fused decoder: grid=(T-1, NV).
#   per t (at vocab tile v==0): init-hidden (t==0 only), gru1 -> attention ->
#   gru2 -> fused readout, store h / readout in scratch.
#   per (t, v): one vocab tile of the affine; online logsumexp + target logit.
#   at the last vocab tile: accumulate masked CE into the (B,1) loss output.
# ----------------------------------------------------------------------------
def _decoder_kernel(emb_ref, tgt_ref, tmask_ref, amask_ref, ctx_ref, keys_ref,
                    initw_ref, initb_ref,
                    wih1_ref, whh1_ref, bih1_ref, bhh1_ref,
                    h2sw_ref, h2sb_ref, a2ow_ref, a2ob_ref,
                    wih2_ref, whh2_ref, bih2_ref, bhh2_ref,
                    row_ref, rob_ref, affw_ref, affb_ref,
                    loss_ref,
                    h_scr, ro_scr, m_scr, s_scr, tl_scr):
    t = pl.program_id(0)
    v = pl.program_id(1)
    nv = pl.num_programs(1)
    H = h_scr.shape[-1]

    # ---- once per call: hidden0 = tanh(init_affine(mean_t enc_ctx)); zero loss ----
    @pl.when(jnp.logical_and(t == 0, v == 0))
    def _():
        ctx = ctx_ref[...]                                   # (B, S, C), pads are 0
        amask = amask_ref[...]                               # (B, S)
        length = jnp.sum(amask, axis=1, keepdims=True)       # (B, 1)
        avg = jnp.sum(ctx, axis=1) * pl.reciprocal(length, approx=True)
        h0 = jnp.tanh(jnp.dot(avg.astype(initw_ref.dtype), initw_ref[...],
                              preferred_element_type=jnp.float32) + initb_ref[...])
        h_scr[...] = h0
        loss_ref[...] = jnp.zeros(loss_ref.shape, loss_ref.dtype)

    # ---- once per decoder step t: gru1 -> attention -> gru2 -> readout ----
    @pl.when(v == 0)
    def _():
        emb = emb_ref[0]                                     # (B, dec_ninp)
        hid = h_scr[...]                                     # (B, H)
        h1 = _gru_cell(emb, hid, wih1_ref[...], whh1_ref[...],
                       bih1_ref[...], bhh1_ref[...], H)

        # attention: keys (= ctx @ s2s_w + b) were hoisted out of the loop
        q = jnp.dot(h1.astype(h2sw_ref.dtype), h2sw_ref[...],
                    preferred_element_type=jnp.float32) + h2sb_ref[...]    # (B, natt)
        a = jnp.tanh(keys_ref[...] + q[:, None, :])                        # (B, S, natt)
        logit = jnp.sum(a * a2ow_ref[...], axis=-1) + a2ob_ref[...]        # (B, S)
        # -1e30 (not -inf) so a hypothetical fully-masked row cannot NaN
        logit = jnp.where(amask_ref[...] > 0.0, logit, -1e30)
        mx = jnp.max(logit, axis=-1, keepdims=True)
        ex = jnp.exp(logit - mx)
        p = ex * pl.reciprocal(jnp.sum(ex, axis=-1, keepdims=True), approx=True)
        attn = jnp.einsum('bqs,bsc->bqc', p[:, None, :], ctx_ref[...],
                          preferred_element_type=jnp.float32)[:, 0, :]     # (B, C)

        h2 = _gru_cell(attn, h1, wih2_ref[...], whh2_ref[...],
                       bih2_ref[...], bhh2_ref[...], H)

        # fused readout: [emb | h2 | attn] @ [e2o; h2o; c2o] + (b_e + b_h + b_c)
        cat = jnp.concatenate([emb, h2, attn], axis=-1)
        ro = jnp.tanh(jnp.dot(cat.astype(row_ref.dtype), row_ref[...],
                              preferred_element_type=jnp.float32) + rob_ref[...])

        h_scr[...] = h2
        ro_scr[...] = ro
        # reset online-CE accumulators for this step
        m_scr[...] = jnp.full(m_scr.shape, -1e30, m_scr.dtype)
        s_scr[...] = jnp.zeros(s_scr.shape, s_scr.dtype)
        tl_scr[...] = jnp.zeros(tl_scr.shape, tl_scr.dtype)

    # ---- every (t, v): one vocab tile of the affine + online logsumexp / target ----
    ro = ro_scr[...]                                                       # (B, nreadout)
    logits = jnp.dot(ro.astype(affw_ref.dtype), affw_ref[...],
                     preferred_element_type=jnp.float32) + affb_ref[...]   # (B, TV)
    # padded vocab columns carry bias -1e30 -> contribute 0 to lse, never hit target
    B, TV = logits.shape
    tile_max = jnp.max(logits, axis=-1, keepdims=True)
    m_prev = m_scr[...]
    m_new = jnp.maximum(m_prev, tile_max)
    s_scr[...] = (s_scr[...] * jnp.exp(m_prev - m_new)
                  + jnp.sum(jnp.exp(logits - m_new), axis=-1, keepdims=True))
    m_scr[...] = m_new
    col = v * TV + lax.broadcasted_iota(jnp.int32, (B, TV), 1)
    hit = col == tgt_ref[0]                                                # (B, TV)
    tl_scr[...] = tl_scr[...] + jnp.sum(jnp.where(hit, logits, 0.0),
                                        axis=-1, keepdims=True)

    @pl.when(v == nv - 1)
    def _():
        lse = m_scr[...] + jnp.log(s_scr[...])
        loss_ref[...] += (lse - tl_scr[...]) * tmask_ref[0]


def decoder_loss(pp, emb_tm, tgt_tm, tmask_tm, amask, ctx, keys):
    Tm1, B, dninp = emb_tm.shape
    _, S, C = ctx.shape
    H = pp['gru1_whh'].shape[0]
    nread = pp['ro_w'].shape[-1]
    ntok_pad = pp['aff_w'].shape[-1]
    TV = min(2048, ntok_pad)
    NV = ntok_pad // TV

    def full(x):
        nd = x.ndim
        return pl.BlockSpec(x.shape, lambda *_, nd=nd: (0,) * nd)

    weights = [pp['init_w'], pp['init_b'],
               pp['gru1_wih'], pp['gru1_whh'], pp['gru1_bih'], pp['gru1_bhh'],
               pp['h2s_w'], pp['h2s_b'], pp['a2o_w'], pp['a2o_b'],
               pp['gru2_wih'], pp['gru2_whh'], pp['gru2_bih'], pp['gru2_bhh'],
               pp['ro_w'], pp['ro_b']]

    in_specs = ([pl.BlockSpec((1, B, dninp), lambda t, v: (t, 0, 0)),   # emb_t
                 pl.BlockSpec((1, B, 1), lambda t, v: (t, 0, 0)),       # target_t
                 pl.BlockSpec((1, B, 1), lambda t, v: (t, 0, 0)),       # target mask_t
                 full(amask), full(ctx), full(keys)]
                + [full(w) for w in weights]
                + [pl.BlockSpec((nread, TV), lambda t, v: (0, v)),      # affine W tile
                   pl.BlockSpec((1, TV), lambda t, v: (0, v))])         # affine b tile

    return pl.pallas_call(
        _decoder_kernel,
        grid=(Tm1, NV),
        in_specs=in_specs,
        out_specs=pl.BlockSpec((B, 1), lambda t, v: (0, 0)),
        out_shape=jax.ShapeDtypeStruct((B, 1), jnp.float32),
        scratch_shapes=[pltpu.VMEM((B, H), jnp.float32),
                        pltpu.VMEM((B, nread), jnp.float32),
                        pltpu.VMEM((B, 1), jnp.float32),
                        pltpu.VMEM((B, 1), jnp.float32),
                        pltpu.VMEM((B, 1), jnp.float32)],
        compiler_params=pltpu.CompilerParams(
            dimension_semantics=("arbitrary", "arbitrary")),
    )(emb_tm, tgt_tm, tmask_tm, amask, ctx, keys, *weights,
      pp['aff_w'], pp['aff_b'])


# ----------------------------------------------------------------------------
# Full RNNSearch forward
# ----------------------------------------------------------------------------
def rnnsearch_forward(pp, src, src_mask, f_trg, f_trg_mask):
    B, S = src.shape
    src_mask_f = src_mask.astype(jnp.float32)

    # Embedding gathers directly in time-major order: no (B,S,D)->(S,B,D)
    # activation transpose is materialized (only tiny int/mask transposes).
    x_tm = pp['enc_emb'][jnp.transpose(src)]              # (S, B, enc_ninp)
    m_tm = jnp.transpose(src_mask_f)[:, :, None]          # (S, B, 1)

    fwd, bwd = bigru_encode(pp, x_tm, m_tm)               # (S,B,H) each, bwd un-reversed
    enc_ctx = jnp.transpose(jnp.concatenate([fwd, bwd], axis=-1), (1, 0, 2))  # (B,S,2H)

    # hoisted (loop-invariant) Bahdanau key projection, computed once
    keys = jnp.einsum('bsc,cn->bsn', enc_ctx, pp['s2s_w']) + pp['s2s_b']      # (B,S,natt)

    T = f_trg.shape[1]
    emb_tm = pp['dec_emb'][jnp.transpose(f_trg[:, :T - 1])]                   # (T-1,B,ninp)
    tgt_tm = jnp.transpose(f_trg[:, 1:])[:, :, None].astype(jnp.int32)        # (T-1,B,1)
    tmask_f = f_trg_mask[:, 1:].astype(jnp.float32)
    tmask_tm = jnp.transpose(tmask_f)[:, :, None]                             # (T-1,B,1)

    loss_b = decoder_loss(pp, emb_tm, tgt_tm, tmask_tm, src_mask_f, enc_ctx, keys)
    loss_vec = loss_b[:, 0]                                                   # (B,)

    w_loss = jnp.sum(loss_vec) / jnp.sum(tmask_f)
    loss = jnp.mean(loss_vec)
    return loss[None], w_loss[None]


# ----------------------------------------------------------------------------
# deterministic synthetic parameters (PyTorch-like per-gate layout) + packing
# ----------------------------------------------------------------------------
def init_params(key, cfg):
    ks = iter(jax.random.split(key, 64))
    nrm = lambda shape: (jax.random.normal(next(ks), shape, jnp.float32) * 0.1)

    def gru_block(nin, nhid):
        # (3, nin, H) / (3, H, H) / (3, 1, H): gate order (r, z, n), pre-transposed
        return (nrm((3, nin, nhid)), nrm((3, nhid, nhid)),
                nrm((3, 1, nhid)), nrm((3, 1, nhid)))

    enc_ninp, enc_nhid = cfg['enc_ninp'], cfg['enc_nhid']
    dec_ninp, dec_nhid = cfg['dec_ninp'], cfg['dec_nhid']
    C = 2 * enc_nhid
    p = {}
    p['enc_emb'] = nrm((cfg['enc_ntok'], enc_ninp)).at[cfg['enc_pad']].set(0.0)
    p['dec_emb'] = nrm((cfg['dec_ntok'], dec_ninp)).at[cfg['dec_pad']].set(0.0)
    (p['enc_f_wih'], p['enc_f_whh'], p['enc_f_bih'], p['enc_f_bhh']) = gru_block(enc_ninp, enc_nhid)
    (p['enc_b_wih'], p['enc_b_whh'], p['enc_b_bih'], p['enc_b_bhh']) = gru_block(enc_ninp, enc_nhid)
    p['init_w'], p['init_b'] = nrm((C, dec_nhid)), nrm((1, dec_nhid))
    (p['gru1_wih'], p['gru1_whh'], p['gru1_bih'], p['gru1_bhh']) = gru_block(dec_ninp, dec_nhid)
    (p['gru2_wih'], p['gru2_whh'], p['gru2_bih'], p['gru2_bhh']) = gru_block(C, dec_nhid)
    p['s2s_w'], p['s2s_b'] = nrm((C, cfg['natt'])), nrm((1, cfg['natt']))
    p['h2s_w'], p['h2s_b'] = nrm((dec_nhid, cfg['natt'])), nrm((1, cfg['natt']))
    p['a2o_w'], p['a2o_b'] = nrm((1, cfg['natt'])), nrm((1, 1))
    p['e2o_w'], p['e2o_b'] = nrm((dec_ninp, cfg['nreadout'])), nrm((1, cfg['nreadout']))
    p['h2o_w'], p['h2o_b'] = nrm((dec_nhid, cfg['nreadout'])), nrm((1, cfg['nreadout']))
    p['c2o_w'], p['c2o_b'] = nrm((C, cfg['nreadout'])), nrm((1, cfg['nreadout']))
    p['aff_w'], p['aff_b'] = nrm((cfg['nreadout'], cfg['dec_ntok'])), nrm((1, cfg['dec_ntok']))
    return p


def pack_params(p, cfg):
    """Pack params into the kernel-friendly layout (done once, outside jit)."""
    bf16 = jnp.bfloat16

    def stack_w(w):      # (3, nin, H) -> (nin, 3H), columns ordered [r | z | n]
        return jnp.transpose(w, (1, 0, 2)).reshape(w.shape[1], 3 * w.shape[2])

    def stack_b(b):      # (3, 1, H) -> (1, 3H)
        return b.reshape(1, 3 * b.shape[2])

    ntok = cfg['dec_ntok']
    nread = cfg['nreadout']
    TV = min(2048, ((ntok + 127) // 128) * 128)      # vocab tile (lane-dense)
    NV = -(-ntok // TV)
    ntok_pad = NV * TV

    pp = {
        'enc_emb': p['enc_emb'],
        'dec_emb': p['dec_emb'],
        'enc_f_wih': stack_w(p['enc_f_wih']).astype(bf16),
        'enc_f_whh': stack_w(p['enc_f_whh']).astype(bf16),
        'enc_f_bih': stack_b(p['enc_f_bih']),
        'enc_f_bhh': stack_b(p['enc_f_bhh']),
        'enc_b_wih': stack_w(p['enc_b_wih']).astype(bf16),
        'enc_b_whh': stack_w(p['enc_b_whh']).astype(bf16),
        'enc_b_bih': stack_b(p['enc_b_bih']),
        'enc_b_bhh': stack_b(p['enc_b_bhh']),
        'init_w': p['init_w'].astype(bf16),
        'init_b': p['init_b'],
        's2s_w': p['s2s_w'],
        's2s_b': p['s2s_b'],
        'h2s_w': p['h2s_w'].astype(bf16),
        'h2s_b': p['h2s_b'],
        'a2o_w': p['a2o_w'],
        'a2o_b': p['a2o_b'],
        'gru1_wih': stack_w(p['gru1_wih']).astype(bf16),
        'gru1_whh': stack_w(p['gru1_whh']).astype(bf16),
        'gru1_bih': stack_b(p['gru1_bih']),
        'gru1_bhh': stack_b(p['gru1_bhh']),
        'gru2_wih': stack_w(p['gru2_wih']).astype(bf16),
        'gru2_whh': stack_w(p['gru2_whh']).astype(bf16),
        'gru2_bih': stack_b(p['gru2_bih']),
        'gru2_bhh': stack_b(p['gru2_bhh']),
        # fused readout: rows ordered to match in-kernel concat [emb | h2 | attn]
        'ro_w': jnp.concatenate([p['e2o_w'], p['h2o_w'], p['c2o_w']], axis=0).astype(bf16),
        'ro_b': p['e2o_b'] + p['h2o_b'] + p['c2o_b'],
        # vocab-padded affine: padded columns get bias -1e30 (excluded from lse),
        # zero weight, and can never match a real target index.
        'aff_w': jnp.zeros((nread, ntok_pad), jnp.float32).at[:, :ntok]
                    .set(p['aff_w']).astype(bf16),
        'aff_b': jnp.full((1, ntok_pad), -1e30, jnp.float32).at[:, :ntok]
                    .set(p['aff_b']),
    }
    return pp


if __name__ == "__main__":
    cfg = dict(enc_ntok=20, dec_ntok=20, enc_ninp=16, dec_ninp=16,
               enc_nhid=32, dec_nhid=32, natt=32, nreadout=32,
               enc_pad=0, dec_pad=0, dec_sos=1, dec_eos=2)
    B, S_src, T_trg = 2, 8, 8

    key = jax.random.PRNGKey(0)
    kp, ks, kt = jax.random.split(key, 3)
    params = init_params(kp, cfg)
    packed = pack_params(params, cfg)

    # source: prefix-valid masks (packed-sequence style), lengths [8, 6]
    src_len = jnp.array([8, 6], dtype=jnp.int32)
    pos_s = jnp.arange(S_src)[None, :]
    src_mask = (pos_s < src_len[:, None]).astype(jnp.int32)
    src = jax.random.randint(ks, (B, S_src), 3, cfg['enc_ntok'], dtype=jnp.int32)
    src = jnp.where(src_mask > 0, src, cfg['enc_pad'])

    # target: <sos> prefix, lengths [8, 7]
    trg_len = jnp.array([8, 7], dtype=jnp.int32)
    pos_t = jnp.arange(T_trg)[None, :]
    f_trg_mask = (pos_t < trg_len[:, None]).astype(jnp.int32)
    f_trg = jax.random.randint(kt, (B, T_trg), 3, cfg['dec_ntok'], dtype=jnp.int32)
    f_trg = f_trg.at[:, 0].set(cfg['dec_sos'])
    f_trg = jnp.where(f_trg_mask > 0, f_trg, cfg['dec_pad'])

    fwd_fn = jax.jit(rnnsearch_forward)
    loss, w_loss = fwd_fn(packed, src, src_mask, f_trg, f_trg_mask)
    jax.block_until_ready((loss, w_loss))
    # TODO(synk): beamsearch() (dynamic-length hypothesis bookkeeping / sorting) is
    # host-side control flow and is not implemented as a kernel.
    print("KERNEL_OK")
</pallas_src>

<mosaic_0001>
module attributes {stable_mosaic.version = 11 : i64} {
  func.func @_bigru_kernel(%arg0: i32, %arg1: memref<1x2x16xf32, #tpu.memory_space<vmem>>, %arg2: memref<1x2x16xf32, #tpu.memory_space<vmem>>, %arg3: memref<8x2x1xf32, #tpu.memory_space<vmem>>, %arg4: memref<16x96xbf16, #tpu.memory_space<vmem>>, %arg5: memref<32x96xbf16, #tpu.memory_space<vmem>>, %arg6: memref<1x96xf32, #tpu.memory_space<vmem>>, %arg7: memref<1x96xf32, #tpu.memory_space<vmem>>, %arg8: memref<16x96xbf16, #tpu.memory_space<vmem>>, %arg9: memref<32x96xbf16, #tpu.memory_space<vmem>>, %arg10: memref<1x96xf32, #tpu.memory_space<vmem>>, %arg11: memref<1x96xf32, #tpu.memory_space<vmem>>, %arg12: memref<1x2x32xf32, #tpu.memory_space<vmem>>, %arg13: memref<1x2x32xf32, #tpu.memory_space<vmem>>, %arg14: memref<2x32xf32, #tpu.memory_space<vmem>>, %arg15: memref<2x32xf32, #tpu.memory_space<vmem>>) attributes {dimension_semantics = [#tpu.dimension_semantics<arbitrary>], iteration_bounds = array<i64: 8>, scalar_prefetch = 0 : i64, scratch_operands = 2 : i64, tpu.core_type = #tpu.core_type<tc>, window_params = [{transform_indices = @transform_0, window_bounds = array<i64: 1, 2, 16>}, {transform_indices = @transform_1, window_bounds = array<i64: 1, 2, 16>}, {pipeline_mode = #tpu.pipeline_mode<synchronous>, transform_indices = @transform_2, window_bounds = array<i64: 8, 2, 1>}, {pipeline_mode = #tpu.pipeline_mode<synchronous>, transform_indices = @transform_3, window_bounds = array<i64: 16, 96>}, {pipeline_mode = #tpu.pipeline_mode<synchronous>, transform_indices = @transform_4, window_bounds = array<i64: 32, 96>}, {pipeline_mode = #tpu.pipeline_mode<synchronous>, transform_indices = @transform_5, window_bounds = array<i64: 1, 96>}, {pipeline_mode = #tpu.pipeline_mode<synchronous>, transform_indices = @transform_6, window_bounds = array<i64: 1, 96>}, {pipeline_mode = #tpu.pipeline_mode<synchronous>, transform_indices = @transform_7, window_bounds = array<i64: 16, 96>}, {pipeline_mode = #tpu.pipeline_mode<synchronous>, transform_indices = @transform_8, window_bounds = array<i64: 32, 96>}, {pipeline_mode = #tpu.pipeline_mode<synchronous>, transform_indices = @transform_9, window_bounds = array<i64: 1, 96>}, {pipeline_mode = #tpu.pipeline_mode<synchronous>, transform_indices = @transform_10, window_bounds = array<i64: 1, 96>}, {transform_indices = @transform_11, window_bounds = array<i64: 1, 2, 32>}, {transform_indices = @transform_12, window_bounds = array<i64: 1, 2, 32>}]} {
    %c0_i32 = arith.constant 0 : i32
    %0 = arith.cmpi eq, %arg0, %c0_i32 : i32
    %1 = arith.extui %0 : i1 to i32
    %c0_i32_0 = arith.constant 0 : i32
    %2 = arith.cmpi ne, %1, %c0_i32_0 : i32
    scf.if %2 {
      %cst_51 = arith.constant 0.000000e+00 : f32
      %118 = vector.broadcast %cst_51 : f32 to vector<2x32xf32>
      %c0_52 = arith.constant 0 : index
      %c0_53 = arith.constant 0 : index
      %119 = vector.load %arg14[%c0_52, %c0_53] : memref<2x32xf32, #tpu.memory_space<vmem>>, vector<2x32xf32>
      tpu.vector_store %arg14[%c0_52, %c0_53], %118 {strides = array<i32>} : memref<2x32xf32, #tpu.memory_space<vmem>>, vector<2x32xf32>,
      %cst_54 = arith.constant 0.000000e+00 : f32
      %120 = vector.broadcast %cst_54 : f32 to vector<2x32xf32>
      %c0_55 = arith.constant 0 : index
      %c0_56 = arith.constant 0 : index
      %121 = vector.load %arg15[%c0_55, %c0_56] : memref<2x32xf32, #tpu.memory_space<vmem>>, vector<2x32xf32>
      tpu.vector_store %arg15[%c0_55, %c0_56], %120 {strides = array<i32>} : memref<2x32xf32, #tpu.memory_space<vmem>>, vector<2x32xf32>,
    } else {
    }
    %c0 = arith.constant 0 : index
    %c0_1 = arith.constant 0 : index
    %c0_2 = arith.constant 0 : index
    %3 = vector.load %arg1[%c0, %c0_1, %c0_2] : memref<1x2x16xf32, #tpu.memory_space<vmem>>, vector<1x2x16xf32>
    %4 = vector.shape_cast %3 : vector<1x2x16xf32> to vector<2x16xf32>
    %5 = arith.index_cast %arg0 : i32 to index
    %c0_3 = arith.constant 0 : index
    %c0_4 = arith.constant 0 : index
    %6 = vector.load %arg3[%5, %c0_3, %c0_4] : memref<8x2x1xf32, #tpu.memory_space<vmem>>, vector<1x2x1xf32>
    %7 = vector.shape_cast %6 : vector<1x2x1xf32> to vector<2x1xf32>
    %c0_5 = arith.constant 0 : index
    %c0_6 = arith.constant 0 : index
    %8 = vector.load %arg14[%c0_5, %c0_6] : memref<2x32xf32, #tpu.memory_space<vmem>>, vector<2x32xf32>
    %c0_7 = arith.constant 0 : index
    %c0_8 = arith.constant 0 : index
    %9 = vector.load %arg4[%c0_7, %c0_8] : memref<16x96xbf16, #tpu.memory_space<vmem>>, vector<16x96xbf16>
    %c0_9 = arith.constant 0 : index
    %c0_10 = arith.constant 0 : index
    %10 = vector.load %arg5[%c0_9, %c0_10] : memref<32x96xbf16, #tpu.memory_space<vmem>>, vector<32x96xbf16>
    %c0_11 = arith.constant 0 : index
    %c0_12 = arith.constant 0 : index
    %11 = vector.load %arg6[%c0_11, %c0_12] : memref<1x96xf32, #tpu.memory_space<vmem>>, vector<1x96xf32>
    %c0_13 = arith.constant 0 : index
    %c0_14 = arith.constant 0 : index
    %12 = vector.load %arg7[%c0_13, %c0_14] : memref<1x96xf32, #tpu.memory_space<vmem>>, vector<1x96xf32>
    %13 = arith.truncf %4 : vector<2x16xf32> to vector<2x16xbf16>
    %cst = arith.constant dense<0.000000e+00> : vector<2x96xf32>
    %14 = tpu.matmul %13, %9, %cst {dimension_numbers = #tpu.dot_dimension_numbers<[1], [0], [0], [1], [0, 0, 1, 1], [], []>} : vector<2x16xbf16>, vector<16x96xbf16>, vector<2x96xf32> -> vector<2x96xf32>
    %15 = vector.broadcast %11 : vector<1x96xf32> to vector<2x96xf32>
    %16 = arith.addf %14, %15 : vector<2x96xf32>
    %17 = arith.truncf %8 : vector<2x32xf32> to vector<2x32xbf16>
    %cst_15 = arith.constant dense<0.000000e+00> : vector<2x96xf32>
    %18 = tpu.matmul %17, %10, %cst_15 {dimension_numbers = #tpu.dot_dimension_numbers<[1], [0], [0], [1], [0, 0, 1, 1], [], []>} : vector<2x32xbf16>, vector<32x96xbf16>, vector<2x96xf32> -> vector<2x96xf32>
    %19 = vector.broadcast %12 : vector<1x96xf32> to vector<2x96xf32>
    %20 = arith.addf %18, %19 : vector<2x96xf32>
    %21 = vector.extract_strided_slice %16 {offsets = [0, 0], sizes = [2, 32], strides = [1, 1]} : vector<2x96xf32> to vector<2x32xf32>
    %22 = vector.extract_strided_slice %20 {offsets = [0, 0], sizes = [2, 32], strides = [1, 1]} : vector<2x96xf32> to vector<2x32xf32>
    %23 = arith.addf %21, %22 : vector<2x32xf32>
    %24 = arith.negf %23 : vector<2x32xf32>
    %25 = math.exp %24 : vector<2x32xf32>
    %cst_16 = arith.constant 1.000000e+00 : f32
    %26 = vector.broadcast %cst_16 : f32 to vector<2x32xf32>
    %27 = arith.addf %26, %25 : vector<2x32xf32>
    %28 = arith.divf %26, %27 : vector<2x32xf32>
    %29 = vector.extract_strided_slice %16 {offsets = [0, 32], sizes = [2, 32], strides = [1, 1]} : vector<2x96xf32> to vector<2x32xf32>
    %30 = vector.extract_strided_slice %20 {offsets = [0, 32], sizes = [2, 32], strides = [1, 1]} : vector<2x96xf32> to vector<2x32xf32>
    %31 = arith.addf %29, %30 : vector<2x32xf32>
    %32 = arith.negf %31 : vector<2x32xf32>
    %33 = math.exp %32 : vector<2x32xf32>
    %cst_17 = arith.constant 1.000000e+00 : f32
    %34 = vector.broadcast %cst_17 : f32 to vector<2x32xf32>
    %35 = arith.addf %34, %33 : vector<2x32xf32>
    %36 = arith.divf %34, %35 : vector<2x32xf32>
    %37 = vector.extract_strided_slice %16 {offsets = [0, 64], sizes = [2, 32], strides = [1, 1]} : vector<2x96xf32> to vector<2x32xf32>
    %38 = vector.extract_strided_slice %20 {offsets = [0, 64], sizes = [2, 32], strides = [1, 1]} : vector<2x96xf32> to vector<2x32xf32>
    %39 = arith.mulf %28, %38 : vector<2x32xf32>
    %40 = arith.addf %37, %39 : vector<2x32xf32>
    %41 = math.tanh %40 : vector<2x32xf32>
    %cst_18 = arith.constant 1.000000e+00 : f32
    %42 = vector.broadcast %cst_18 : f32 to vector<2x32xf32>
    %43 = arith.subf %42, %36 : vector<2x32xf32>
    %44 = arith.mulf %43, %41 : vector<2x32xf32>
    %45 = arith.mulf %36, %8 : vector<2x32xf32>
    %46 = arith.addf %44, %45 : vector<2x32xf32>
    %47 = vector.broadcast %7 : vector<2x1xf32> to vector<2x32xf32>
    %48 = arith.mulf %47, %46 : vector<2x32xf32>
    %c0_19 = arith.constant 0 : index
    %c0_20 = arith.constant 0 : index
    %c0_21 = arith.constant 0 : index
    %49 = vector.load %arg12[%c0_19, %c0_20, %c0_21] : memref<1x2x32xf32, #tpu.memory_space<vmem>>, vector<1x2x32xf32>
    %50 = vector.shape_cast %49 : vector<1x2x32xf32> to vector<2x32xf32>
    %51 = vector.shape_cast %48 : vector<2x32xf32> to vector<1x2x32xf32>
    tpu.vector_store %arg12[%c0_19, %c0_20, %c0_21], %51 {strides = array<i32>} : memref<1x2x32xf32, #tpu.memory_space<vmem>>, vector<1x2x32xf32>,
    %52 = vector.broadcast %7 : vector<2x1xf32> to vector<2x32xf32>
    %53 = arith.mulf %52, %46 : vector<2x32xf32>
    %cst_22 = arith.constant 1.000000e+00 : f32
    %54 = vector.broadcast %cst_22 : f32 to vector<2x1xf32>
    %55 = arith.subf %54, %7 : vector<2x1xf32>
    %56 = vector.broadcast %55 : vector<2x1xf32> to vector<2x32xf32>
    %57 = arith.mulf %56, %8 : vector<2x32xf32>
    %58 = arith.addf %53, %57 : vector<2x32xf32>
    %c0_23 = arith.constant 0 : index
    %c0_24 = arith.constant 0 : index
    %59 = vector.load %arg14[%c0_23, %c0_24] : memref<2x32xf32, #tpu.memory_space<vmem>>, vector<2x32xf32>
    tpu.vector_store %arg14[%c0_23, %c0_24], %58 {strides = array<i32>} : memref<2x32xf32, #tpu.memory_space<vmem>>, vector<2x32xf32>,
    %c0_25 = arith.constant 0 : index
    %c0_26 = arith.constant 0 : index
    %c0_27 = arith.constant 0 : index
    %60 = vector.load %arg2[%c0_25, %c0_26, %c0_27] : memref<1x2x16xf32, #tpu.memory_space<vmem>>, vector<1x2x16xf32>
    %61 = vector.shape_cast %60 : vector<1x2x16xf32> to vector<2x16xf32>
    %c7_i32 = arith.constant 7 : i32
    %62 = arith.subi %c7_i32, %arg0 : i32
    %63 = arith.index_cast %62 : i32 to index
    %c0_28 = arith.constant 0 : index
    %c0_29 = arith.constant 0 : index
    %64 = vector.load %arg3[%63, %c0_28, %c0_29] : memref<8x2x1xf32, #tpu.memory_space<vmem>>, vector<1x2x1xf32>
    %65 = vector.shape_cast %64 : vector<1x2x1xf32> to vector<2x1xf32>
    %c0_30 = arith.constant 0 : index
    %c0_31 = arith.constant 0 : index
    %66 = vector.load %arg15[%c0_30, %c0_31] : memref<2x32xf32, #tpu.memory_space<vmem>>, vector<2x32xf32>
    %c0_32 = arith.constant 0 : index
    %c0_33 = arith.constant 0 : index
    %67 = vector.load %arg8[%c0_32, %c0_33] : memref<16x96xbf16, #tpu.memory_space<vmem>>, vector<16x96xbf16>
    %c0_34 = arith.constant 0 : index
    %c0_35 = arith.constant 0 : index
    %68 = vector.load %arg9[%c0_34, %c0_35] : memref<32x96xbf16, #tpu.memory_space<vmem>>, vector<32x96xbf16>
    %c0_36 = arith.constant 0 : index
    %c0_37 = arith.constant 0 : index
    %69 = vector.load %arg10[%c0_36, %c0_37] : memref<1x96xf32, #tpu.memory_space<vmem>>, vector<1x96xf32>
    %c0_38 = arith.constant 0 : index
    %c0_39 = arith.constant 0 : index
    %70 = vector.load %arg11[%c0_38, %c0_39] : memref<1x96xf32, #tpu.memory_space<vmem>>, vector<1x96xf32>
    %71 = arith.truncf %61 : vector<2x16xf32> to vector<2x16xbf16>
    %cst_40 = arith.constant dense<0.000000e+00> : vector<2x96xf32>
    %72 = tpu.matmul %71, %67, %cst_40 {dimension_numbers = #tpu.dot_dimension_numbers<[1], [0], [0], [1], [0, 0, 1, 1], [], []>} : vector<2x16xbf16>, vector<16x96xbf16>, vector<2x96xf32> -> vector<2x96xf32>
    %73 = vector.broadcast %69 : vector<1x96xf32> to vector<2x96xf32>
    %74 = arith.addf %72, %73 : vector<2x96xf32>
    %75 = arith.truncf %66 : vector<2x32xf32> to vector<2x32xbf16>
    %cst_41 = arith.constant dense<0.000000e+00> : vector<2x96xf32>
    %76 = tpu.matmul %75, %68, %cst_41 {dimension_numbers = #tpu.dot_dimension_numbers<[1], [0], [0], [1], [0, 0, 1, 1], [], []>} : vector<2x32xbf16>, vector<32x96xbf16>, vector<2x96xf32> -> vector<2x96xf32>
    %77 = vector.broadcast %70 : vector<1x96xf32> to vector<2x96xf32>
    %78 = arith.addf %76, %77 : vector<2x96xf32>
    %79 = vector.extract_strided_slice %74 {offsets = [0, 0], sizes = [2, 32], strides = [1, 1]} : vector<2x96xf32> to vector<2x32xf32>
    %80 = vector.extract_strided_slice %78 {offsets = [0, 0], sizes = [2, 32], strides = [1, 1]} : vector<2x96xf32> to vector<2x32xf32>
    %81 = arith.addf %79, %80 : vector<2x32xf32>
    %82 = arith.negf %81 : vector<2x32xf32>
    %83 = math.exp %82 : vector<2x32xf32>
    %cst_42 = arith.constant 1.000000e+00 : f32
    %84 = vector.broadcast %cst_42 : f32 to vector<2x32xf32>
    %85 = arith.addf %84, %83 : vector<2x32xf32>
    %86 = arith.divf %84, %85 : vector<2x32xf32>
    %87 = vector.extract_strided_slice %74 {offsets = [0, 32], sizes = [2, 32], strides = [1, 1]} : vector<2x96xf32> to vector<2x32xf32>
    %88 = vector.extract_strided_slice %78 {offsets = [0, 32], sizes = [2, 32], strides = [1, 1]} : vector<2x96xf32> to vector<2x32xf32>
    %89 = arith.addf %87, %88 : vector<2x32xf32>
    %90 = arith.negf %89 : vector<2x32xf32>
    %91 = math.exp %90 : vector<2x32xf32>
    %cst_43 = arith.constant 1.000000e+00 : f32
    %92 = vector.broadcast %cst_43 : f32 to vector<2x32xf32>
    %93 = arith.addf %92, %91 : vector<2x32xf32>
    %94 = arith.divf %92, %93 : vector<2x32xf32>
    %95 = vector.extract_strided_slice %74 {offsets = [0, 64], sizes = [2, 32], strides = [1, 1]} : vector<2x96xf32> to vector<2x32xf32>
    %96 = vector.extract_strided_slice %78 {offsets = [0, 64], sizes = [2, 32], strides = [1, 1]} : vector<2x96xf32> to vector<2x32xf32>
    %97 = arith.mulf %86, %96 : vector<2x32xf32>
    %98 = arith.addf %95, %97 : vector<2x32xf32>
    %99 = math.tanh %98 : vector<2x32xf32>
    %cst_44 = arith.constant 1.000000e+00 : f32
    %100 = vector.broadcast %cst_44 : f32 to vector<2x32xf32>
    %101 = arith.subf %100, %94 : vector<2x32xf32>
    %102 = arith.mulf %101, %99 : vector<2x32xf32>
    %103 = arith.mulf %94, %66 : vector<2x32xf32>
    %104 = arith.addf %102, %103 : vector<2x32xf32>
    %105 = vector.broadcast %65 : vector<2x1xf32> to vector<2x32xf32>
    %106 = arith.mulf %105, %104 : vector<2x32xf32>
    %c0_45 = arith.constant 0 : index
    %c0_46 = arith.constant 0 : index
    %c0_47 = arith.constant 0 : index
    %107 = vector.load %arg13[%c0_45, %c0_46, %c0_47] : memref<1x2x32xf32, #tpu.memory_space<vmem>>, vector<1x2x32xf32>
    %108 = vector.shape_cast %107 : vector<1x2x32xf32> to vector<2x32xf32>
    %109 = vector.shape_cast %106 : vector<2x32xf32> to vector<1x2x32xf32>
    tpu.vector_store %arg13[%c0_45, %c0_46, %c0_47], %109 {strides = array<i32>} : memref<1x2x32xf32, #tpu.memory_space<vmem>>, vector<1x2x32xf32>,
    %110 = vector.broadcast %65 : vector<2x1xf32> to vector<2x32xf32>
    %111 = arith.mulf %110, %104 : vector<2x32xf32>
    %cst_48 = arith.constant 1.000000e+00 : f32
    %112 = vector.broadcast %cst_48 : f32 to vector<2x1xf32>
    %113 = arith.subf %112, %65 : vector<2x1xf32>
    %114 = vector.broadcast %113 : vector<2x1xf32> to vector<2x32xf32>
    %115 = arith.mulf %114, %66 : vector<2x32xf32>
    %116 = arith.addf %111, %115 : vector<2x32xf32>
    %c0_49 = arith.constant 0 : index
    %c0_50 = arith.constant 0 : index
    %117 = vector.load %arg15[%c0_49, %c0_50] : memref<2x32xf32, #tpu.memory_space<vmem>>, vector<2x32xf32>
    tpu.vector_store %arg15[%c0_49, %c0_50], %116 {strides = array<i32>} : memref<2x32xf32, #tpu.memory_space<vmem>>, vector<2x32xf32>,
    return
  }
  func.func @transform_0(%arg0: i32) -> (i32, i32, i32) {
    %c0_i32 = arith.constant 0 : i32
    %c0_i32_0 = arith.constant 0 : i32
    %c0_i32_1 = arith.constant 0 : i32
    return %arg0, %c0_i32, %c0_i32_0 : i32, i32, i32
  }
  func.func @transform_1(%arg0: i32) -> (i32, i32, i32) {
    %c7_i32 = arith.constant 7 : i32
    %0 = arith.subi %c7_i32, %arg0 : i32
    %c0_i32 = arith.constant 0 : i32
    %c0_i32_0 = arith.constant 0 : i32
    %c0_i32_1 = arith.constant 0 : i32
    return %0, %c0_i32, %c0_i32_0 : i32, i32, i32
  }
  func.func @transform_2(%arg0: i32) -> (i32, i32, i32) {
    %c0_i32 = arith.constant 0 : i32
    %c0_i32_0 = arith.constant 0 : i32
    %c0_i32_1 = arith.constant 0 : i32
    %c0_i32_2 = arith.constant 0 : i32
    return %c0_i32, %c0_i32_0, %c0_i32_1 : i32, i32, i32
  }
  func.func @transform_3(%arg0: i32) -> (i32, i32) {
    %c0_i32 = arith.constant 0 : i32
    %c0_i32_0 = arith.constant 0 : i32
    %c0_i32_1 = arith.constant 0 : i32
    return %c0_i32, %c0_i32_0 : i32, i32
  }
  func.func @transform_4(%arg0: i32) -> (i32, i32) {
    %c0_i32 = arith.constant 0 : i32
    %c0_i32_0 = arith.constant 0 : i32
    %c0_i32_1 = arith.constant 0 : i32
    return %c0_i32, %c0_i32_0 : i32, i32
  }
  func.func @transform_5(%arg0: i32) -> (i32, i32) {
    %c0_i32 = arith.constant 0 : i32
    %c0_i32_0 = arith.constant 0 : i32
    %c0_i32_1 = arith.constant 0 : i32
    return %c0_i32, %c0_i32_0 : i32, i32
  }
  func.func @transform_6(%arg0: i32) -> (i32, i32) {
    %c0_i32 = arith.constant 0 : i32
    %c0_i32_0 = arith.constant 0 : i32
    %c0_i32_1 = arith.constant 0 : i32
    return %c0_i32, %c0_i32_0 : i32, i32
  }
  func.func @transform_7(%arg0: i32) -> (i32, i32) {
    %c0_i32 = arith.constant 0 : i32
    %c0_i32_0 = arith.constant 0 : i32
    %c0_i32_1 = arith.constant 0 : i32
    return %c0_i32, %c0_i32_0 : i32, i32
  }
  func.func @transform_8(%arg0: i32) -> (i32, i32) {
    %c0_i32 = arith.constant 0 : i32
    %c0_i32_0 = arith.constant 0 : i32
    %c0_i32_1 = arith.constant 0 : i32
    return %c0_i32, %c0_i32_0 : i32, i32
  }
  func.func @transform_9(%arg0: i32) -> (i32, i32) {
    %c0_i32 = arith.constant 0 : i32
    %c0_i32_0 = arith.constant 0 : i32
    %c0_i32_1 = arith.constant 0 : i32
    return %c0_i32, %c0_i32_0 : i32, i32
  }
  func.func @transform_10(%arg0: i32) -> (i32, i32) {
    %c0_i32 = arith.constant 0 : i32
    %c0_i32_0 = arith.constant 0 : i32
    %c0_i32_1 = arith.constant 0 : i32
    return %c0_i32, %c0_i32_0 : i32, i32
  }
  func.func @transform_11(%arg0: i32) -> (i32, i32, i32) {
    %c0_i32 = arith.constant 0 : i32
    %c0_i32_0 = arith.constant 0 : i32
    %c0_i32_1 = arith.constant 0 : i32
    return %arg0, %c0_i32, %c0_i32_0 : i32, i32, i32
  }
  func.func @transform_12(%arg0: i32) -> (i32, i32, i32) {
    %c7_i32 = arith.constant 7 : i32
    %0 = arith.subi %c7_i32, %arg0 : i32
    %c0_i32 = arith.constant 0 : i32
    %c0_i32_0 = arith.constant 0 : i32
    %c0_i32_1 = arith.constant 0 : i32
    return %0, %c0_i32, %c0_i32_0 : i32, i32, i32
  }
}

module attributes {stable_mosaic.version = 11 : i64} {
  func.func @_decoder_kernel(%arg0: i32, %arg1: i32, %arg2: memref<1x2x16xf32, #tpu.memory_space<vmem>>, %arg3: memref<1x2x1xi32, #tpu.memory_space<vmem>>, %arg4: memref<1x2x1xf32, #tpu.memory_space<vmem>>, %arg5: memref<2x8xf32, #tpu.memory_space<vmem>>, %arg6: memref<2x8x64xf32, #tpu.memory_space<vmem>>, %arg7: memref<2x8x32xf32, #tpu.memory_space<vmem>>, %arg8: memref<64x32xbf16, #tpu.memory_space<vmem>>, %arg9: memref<1x32xf32, #tpu.memory_space<vmem>>, %arg10: memref<16x96xbf16, #tpu.memory_space<vmem>>, %arg11: memref<32x96xbf16, #tpu.memory_space<vmem>>, %arg12: memref<1x96xf32, #tpu.memory_space<vmem>>, %arg13: memref<1x96xf32, #tpu.memory_space<vmem>>, %arg14: memref<32x32xbf16, #tpu.memory_space<vmem>>, %arg15: memref<1x32xf32, #tpu.memory_space<vmem>>, %arg16: memref<1x32xf32, #tpu.memory_space<vmem>>, %arg17: memref<1x1xf32, #tpu.memory_space<vmem>>, %arg18: memref<64x96xbf16, #tpu.memory_space<vmem>>, %arg19: memref<32x96xbf16, #tpu.memory_space<vmem>>, %arg20: memref<1x96xf32, #tpu.memory_space<vmem>>, %arg21: memref<1x96xf32, #tpu.memory_space<vmem>>, %arg22: memref<112x32xbf16, #tpu.memory_space<vmem>>, %arg23: memref<1x32xf32, #tpu.memory_space<vmem>>, %arg24: memref<32x128xbf16, #tpu.memory_space<vmem>>, %arg25: memref<1x128xf32, #tpu.memory_space<vmem>>, %arg26: memref<2x1xf32, #tpu.memory_space<vmem>>, %arg27: memref<2x32xf32, #tpu.memory_space<vmem>>, %arg28: memref<2x32xf32, #tpu.memory_space<vmem>>, %arg29: memref<2x1xf32, #tpu.memory_space<vmem>>, %arg30: memref<2x1xf32, #tpu.memory_space<vmem>>, %arg31: memref<2x1xf32, #tpu.memory_space<vmem>>) attributes {dimension_semantics = [#tpu.dimension_semantics<arbitrary>, #tpu.dimension_semantics<arbitrary>], iteration_bounds = array<i64: 7, 1>, scalar_prefetch = 0 : i64, scratch_operands = 5 : i64, tpu.core_type = #tpu.core_type<tc>, window_params = [{transform_indices = @transform_0, window_bounds = array<i64: 1, 2, 16>}, {transform_indices = @transform_1, window_bounds = array<i64: 1, 2, 1>}, {transform_indices = @transform_2, window_bounds = array<i64: 1, 2, 1>}, {pipeline_mode = #tpu.pipeline_mode<synchronous>, transform_indices = @transform_3, window_bounds = array<i64: 2, 8>}, {pipeline_mode = #tpu.pipeline_mode<synchronous>, transform_indices = @transform_4, window_bounds = array<i64: 2, 8, 64>}, {pipeline_mode = #tpu.pipeline_mode<synchronous>, transform_indices = @transform_5, window_bounds = array<i64: 2, 8, 32>}, {pipeline_mode = #tpu.pipeline_mode<synchronous>, transform_indices = @transform_6, window_bounds = array<i64: 64, 32>}, {pipeline_mode = #tpu.pipeline_mode<synchronous>, transform_indices = @transform_7, window_bounds = array<i64: 1, 32>}, {pipeline_mode = #tpu.pipeline_mode<synchronous>, transform_indices = @transform_8, window_bounds = array<i64: 16, 96>}, {pipeline_mode = #tpu.pipeline_mode<synchronous>, transform_indices = @transform_9, window_bounds = array<i64: 32, 96>}, {pipeline_mode = #tpu.pipeline_mode<synchronous>, transform_indices = @transform_10, window_bounds = array<i64: 1, 96>}, {pipeline_mode = #tpu.pipeline_mode<synchronous>, transform_indices = @transform_11, window_bounds = array<i64: 1, 96>}, {pipeline_mode = #tpu.pipeline_mode<synchronous>, transform_indices = @transform_12, window_bounds = array<i64: 32, 32>}, {pipeline_mode = #tpu.pipeline_mode<synchronous>, transform_indices = @transform_13, window_bounds = array<i64: 1, 32>}, {pipeline_mode = #tpu.pipeline_mode<synchronous>, transform_indices = @transform_14, window_bounds = array<i64: 1, 32>}, {pipeline_mode = #tpu.pipeline_mode<synchronous>, transform_indices = @transform_15, window_bounds = array<i64: 1, 1>}, {pipeline_mode = #tpu.pipeline_mode<synchronous>, transform_indices = @transform_16, window_bounds = array<i64: 64, 96>}, {pipeline_mode = #tpu.pipeline_mode<synchronous>, transform_indices = @transform_17, window_bounds = array<i64: 32, 96>}, {pipeline_mode = #tpu.pipeline_mode<synchronous>, transform_indices = @transform_18, window_bounds = array<i64: 1, 96>}, {pipeline_mode = #tpu.pipeline_mode<synchronous>, transform_indices = @transform_19, window_bounds = array<i64: 1, 96>}, {pipeline_mode = #tpu.pipeline_mode<synchronous>, transform_indices = @transform_20, window_bounds = array<i64: 112, 32>}, {pipeline_mode = #tpu.pipeline_mode<synchronous>, transform_indices = @transform_21, window_bounds = array<i64: 1, 32>}, {transform_indices = @transform_22, window_bounds = array<i64: 32, 128>}, {transform_indices = @transform_23, window_bounds = array<i64: 1, 128>}, {pipeline_mode = #tpu.pipeline_mode<synchronous>, transform_indices = @transform_24, window_bounds = array<i64: 2, 1>}]} {
    %c0_i32 = arith.constant 0 : i32
    %0 = arith.cmpi eq, %arg0, %c0_i32 : i32
    %c0_i32_0 = arith.constant 0 : i32
    %1 = arith.cmpi eq, %arg1, %c0_i32_0 : i32
    %2 = arith.andi %0, %1 : i1
    %3 = arith.extui %2 : i1 to i32
    %c0_i32_1 = arith.constant 0 : i32
    %4 = arith.cmpi ne, %3, %c0_i32_1 : i32
    scf.if %4 {
      %c0_30 = arith.constant 0 : index
      %c0_31 = arith.constant 0 : index
      %c0_32 = arith.constant 0 : index
      %49 = vector.load %arg6[%c0_30, %c0_31, %c0_32] : memref<2x8x64xf32, #tpu.memory_space<vmem>>, vector<2x8x64xf32>
      %c0_33 = arith.constant 0 : index
      %c0_34 = arith.constant 0 : index
      %50 = vector.load %arg5[%c0_33, %c0_34] : memref<2x8xf32, #tpu.memory_space<vmem>>, vector<2x8xf32>
      %cst_35 = arith.constant dense<0.000000e+00> : vector<2xf32>
      %51 = vector.multi_reduction <add>, %50, %cst_35 [1] : vector<2x8xf32> to vector<2xf32>
      %52 = vector.shape_cast %51 : vector<2xf32> to vector<2x1xf32>
      %cst_36 = arith.constant dense<0.000000e+00> : vector<2x64xf32>
      %53 = vector.multi_reduction <add>, %49, %cst_36 [1] : vector<2x8x64xf32> to vector<2x64xf32>
      %54 = tpu.reciprocal %52 {approx = true} : vector<2x1xf32> -> vector<2x1xf32>
      %55 = vector.broadcast %54 : vector<2x1xf32> to vector<2x64xf32>
      %56 = arith.mulf %53, %55 : vector<2x64xf32>
      %57 = arith.truncf %56 : vector<2x64xf32> to vector<2x64xbf16>
      %c0_37 = arith.constant 0 : index
      %c0_38 = arith.constant 0 : index
      %58 = vector.load %arg8[%c0_37, %c0_38] : memref<64x32xbf16, #tpu.memory_space<vmem>>, vector<64x32xbf16>
      %cst_39 = arith.constant dense<0.000000e+00> : vector<2x32xf32>
      %59 = tpu.matmul %57, %58, %cst_39 {dimension_numbers = #tpu.dot_dimension_numbers<[1], [0], [0], [1], [0, 0, 1, 1], [], []>} : vector<2x64xbf16>, vector<64x32xbf16>, vector<2x32xf32> -> vector<2x32xf32>
      %c0_40 = arith.constant 0 : index
      %c0_41 = arith.constant 0 : index
      %60 = vector.load %arg9[%c0_40, %c0_41] : memref<1x32xf32, #tpu.memory_space<vmem>>, vector<1x32xf32>
      %61 = vector.broadcast %60 : vector<1x32xf32> to vector<2x32xf32>
      %62 = arith.addf %59, %61 : vector<2x32xf32>
      %63 = math.tanh %62 : vector<2x32xf32>
      %c0_42 = arith.constant 0 : index
      %c0_43 = arith.constant 0 : index
      %64 = vector.load %arg27[%c0_42, %c0_43] : memref<2x32xf32, #tpu.memory_space<vmem>>, vector<2x32xf32>
      tpu.vector_store %arg27[%c0_42, %c0_43], %63 {strides = array<i32>} : memref<2x32xf32, #tpu.memory_space<vmem>>, vector<2x32xf32>,
      %cst_44 = arith.constant 0.000000e+00 : f32
      %65 = vector.broadcast %cst_44 : f32 to vector<2x1xf32>
      %c0_45 = arith.constant 0 : index
      %c0_46 = arith.constant 0 : index
      %66 = vector.load %arg26[%c0_45, %c0_46] : memref<2x1xf32, #tpu.memory_space<vmem>>, vector<2x1xf32>
      tpu.vector_store %arg26[%c0_45, %c0_46], %65 {strides = array<i32>} : memref<2x1xf32, #tpu.memory_space<vmem>>, vector<2x1xf32>,
    } else {
    }
    %c0_i32_2 = arith.constant 0 : i32
    %5 = arith.cmpi eq, %arg1, %c0_i32_2 : i32
    %6 = arith.extui %5 : i1 to i32
    %c0_i32_3 = arith.constant 0 : i32
    %7 = arith.cmpi ne, %6, %c0_i32_3 : i32
    scf.if %7 {
      %c0_30 = arith.constant 0 : index
      %c0_31 = arith.constant 0 : index
      %c0_32 = arith.constant 0 : index
      %49 = vector.load %arg2[%c0_30, %c0_31, %c0_32] : memref<1x2x16xf32, #tpu.memory_space<vmem>>, vector<1x2x16xf32>
      %50 = vector.shape_cast %49 : vector<1x2x16xf32> to vector<2x16xf32>
      %c0_33 = arith.constant 0 : index
      %c0_34 = arith.constant 0 : index
      %51 = vector.load %arg27[%c0_33, %c0_34] : memref<2x32xf32, #tpu.memory_space<vmem>>, vector<2x32xf32>
      %c0_35 = arith.constant 0 : index
      %c0_36 = arith.constant 0 : index
      %52 = vector.load %arg10[%c0_35, %c0_36] : memref<16x96xbf16, #tpu.memory_space<vmem>>, vector<16x96xbf16>
      %c0_37 = arith.constant 0 : index
      %c0_38 = arith.constant 0 : index
      %53 = vector.load %arg11[%c0_37, %c0_38] : memref<32x96xbf16, #tpu.memory_space<vmem>>, vector<32x96xbf16>
      %c0_39 = arith.constant 0 : index
      %c0_40 = arith.constant 0 : index
      %54 = vector.load %arg12[%c0_39, %c0_40] : memref<1x96xf32, #tpu.memory_space<vmem>>, vector<1x96xf32>
      %c0_41 = arith.constant 0 : index
      %c0_42 = arith.constant 0 : index
      %55 = vector.load %arg13[%c0_41, %c0_42] : memref<1x96xf32, #tpu.memory_space<vmem>>, vector<1x96xf32>
      %56 = arith.truncf %50 : vector<2x16xf32> to vector<2x16xbf16>
      %cst_43 = arith.constant dense<0.000000e+00> : vector<2x96xf32>
      %57 = tpu.matmul %56, %52, %cst_43 {dimension_numbers = #tpu.dot_dimension_numbers<[1], [0], [0], [1], [0, 0, 1, 1], [], []>} : vector<2x16xbf16>, vector<16x96xbf16>, vector<2x96xf32> -> vector<2x96xf32>
      %58 = vector.broadcast %54 : vector<1x96xf32> to vector<2x96xf32>
      %59 = arith.addf %57, %58 : vector<2x96xf32>
      %60 = arith.truncf %51 : vector<2x32xf32> to vector<2x32xbf16>
      %cst_44 = arith.constant dense<0.000000e+00> : vector<2x96xf32>
      %61 = tpu.matmul %60, %53, %cst_44 {dimension_numbers = #tpu.dot_dimension_numbers<[1], [0], [0], [1], [0, 0, 1, 1], [], []>} : vector<2x32xbf16>, vector<32x96xbf16>, vector<2x96xf32> -> vector<2x96xf32>
      %62 = vector.broadcast %55 : vector<1x96xf32> to vector<2x96xf32>
      %63 = arith.addf %61, %62 : vector<2x96xf32>
      %64 = vector.extract_strided_slice %59 {offsets = [0, 0], sizes = [2, 32], strides = [1, 1]} : vector<2x96xf32> to vector<2x32xf32>
      %65 = vector.extract_strided_slice %63 {offsets = [0, 0], sizes = [2, 32], strides = [1, 1]} : vector<2x96xf32> to vector<2x32xf32>
      %66 = arith.addf %64, %65 : vector<2x32xf32>
      %67 = arith.negf %66 : vector<2x32xf32>
      %68 = math.exp %67 : vector<2x32xf32>
      %cst_45 = arith.constant 1.000000e+00 : f32
      %69 = vector.broadcast %cst_45 : f32 to vector<2x32xf32>
      %70 = arith.addf %69, %68 : vector<2x32xf32>
      %71 = arith.divf %69, %70 : vector<2x32xf32>
      %72 = vector.extract_strided_slice %59 {offsets = [0, 32], sizes = [2, 32], strides = [1, 1]} : vector<2x96xf32> to vector<2x32xf32>
      %73 = vector.extract_strided_slice %63 {offsets = [0, 32], sizes = [2, 32], strides = [1, 1]} : vector<2x96xf32> to vector<2x32xf32>
      %74 = arith.addf %72, %73 : vector<2x32xf32>
      %75 = arith.negf %74 : vector<2x32xf32>
      %76 = math.exp %75 : vector<2x32xf32>
      %cst_46 = arith.constant 1.000000e+00 : f32
      %77 = vector.broadcast %cst_46 : f32 to vector<2x32xf32>
      %78 = arith.addf %77, %76 : vector<2x32xf32>
      %79 = arith.divf %77, %78 : vector<2x32xf32>
      %80 = vector.extract_strided_slice %59 {offsets = [0, 64], sizes = [2, 32], strides = [1, 1]} : vector<2x96xf32> to vector<2x32xf32>
      %81 = vector.extract_strided_slice %63 {offsets = [0, 64], sizes = [2, 32], strides = [1, 1]} : vector<2x96xf32> to vector<2x32xf32>
      %82 = arith.mulf %71, %81 : vector<2x32xf32>
      %83 = arith.addf %80, %82 : vector<2x32xf32>
      %84 = math.tanh %83 : vector<2x32xf32>
      %cst_47 = arith.constant 1.000000e+00 : f32
      %85 = vector.broadcast %cst_47 : f32 to vector<2x32xf32>
      %86 = arith.subf %85, %79 : vector<2x32xf32>
      %87 = arith.mulf %86, %84 : vector<2x32xf32>
      %88 = arith.mulf %79, %51 : vector<2x32xf32>
      %89 = arith.addf %87, %88 : vector<2x32xf32>
      %90 = arith.truncf %89 : vector<2x32xf32> to vector<2x32xbf16>
      %c0_48 = arith.constant 0 : index
      %c0_49 = arith.constant 0 : index
      %91 = vector.load %arg14[%c0_48, %c0_49] : memref<32x32xbf16, #tpu.memory_space<vmem>>, vector<32x32xbf16>
      %cst_50 = arith.constant dense<0.000000e+00> : vector<2x32xf32>
      %92 = tpu.matmul %90, %91, %cst_50 {dimension_numbers = #tpu.dot_dimension_numbers<[1], [0], [0], [1], [0, 0, 1, 1], [], []>} : vector<2x32xbf16>, vector<32x32xbf16>, vector<2x32xf32> -> vector<2x32xf32>
      %c0_51 = arith.constant 0 : index
      %c0_52 = arith.constant 0 : index
      %93 = vector.load %arg15[%c0_51, %c0_52] : memref<1x32xf32, #tpu.memory_space<vmem>>, vector<1x32xf32>
      %94 = vector.broadcast %93 : vector<1x32xf32> to vector<2x32xf32>
      %95 = arith.addf %92, %94 : vector<2x32xf32>
      %c0_53 = arith.constant 0 : index
      %c0_54 = arith.constant 0 : index
      %c0_55 = arith.constant 0 : index
      %96 = vector.load %arg7[%c0_53, %c0_54, %c0_55] : memref<2x8x32xf32, #tpu.memory_space<vmem>>, vector<2x8x32xf32>
      %97 = vector.shape_cast %95 : vector<2x32xf32> to vector<2x1x32xf32>
      %98 = vector.broadcast %97 : vector<2x1x32xf32> to vector<2x8x32xf32>
      %99 = arith.addf %96, %98 : vector<2x8x32xf32>
      %100 = math.tanh %99 : vector<2x8x32xf32>
      %c0_56 = arith.constant 0 : index
      %c0_57 = arith.constant 0 : index
      %101 = vector.load %arg16[%c0_56, %c0_57] : memref<1x32xf32, #tpu.memory_space<vmem>>, vector<1x32xf32>
      %102 = vector.shape_cast %101 : vector<1x32xf32> to vector<1x1x32xf32>
      %103 = vector.broadcast %102 : vector<1x1x32xf32> to vector<2x8x32xf32>
      %104 = arith.mulf %100, %103 : vector<2x8x32xf32>
      %cst_58 = arith.constant dense<0.000000e+00> : vector<2x8xf32>
      %105 = vector.multi_reduction <add>, %104, %cst_58 [2] : vector<2x8x32xf32> to vector<2x8xf32>
      %c0_59 = arith.constant 0 : index
      %c0_60 = arith.constant 0 : index
      %106 = vector.load %arg17[%c0_59, %c0_60] : memref<1x1xf32, #tpu.memory_space<vmem>>, vector<1x1xf32>
      %107 = vector.broadcast %106 : vector<1x1xf32> to vector<2x8xf32>
      %108 = arith.addf %105, %107 : vector<2x8xf32>
      %c0_61 = arith.constant 0 : index
      %c0_62 = arith.constant 0 : index
      %109 = vector.load %arg5[%c0_61, %c0_62] : memref<2x8xf32, #tpu.memory_space<vmem>>, vector<2x8xf32>
      %cst_63 = arith.constant 0.000000e+00 : f32
      %110 = vector.broadcast %cst_63 : f32 to vector<2x8xf32>
      %111 = arith.cmpf ogt, %109, %110 : vector<2x8xf32>
      %cst_64 = arith.constant -1.000000e+30 : f32
      %112 = vector.broadcast %cst_64 : f32 to vector<2x8xf32>
      %113 = arith.select %111, %108, %112 : vector<2x8xi1>, vector<2x8xf32>
      %cst_65 = arith.constant dense<0xFF800000> : vector<2xf32>
      %114 = vector.multi_reduction <maximumf>, %113, %cst_65 [1] : vector<2x8xf32> to vector<2xf32>
      %115 = vector.shape_cast %114 : vector<2xf32> to vector<2x1xf32>
      %116 = vector.broadcast %115 : vector<2x1xf32> to vector<2x8xf32>
      %117 = arith.subf %113, %116 : vector<2x8xf32>
      %118 = math.exp %117 : vector<2x8xf32>
      %cst_66 = arith.constant dense<0.000000e+00> : vector<2xf32>
      %119 = vector.multi_reduction <add>, %118, %cst_66 [1] : vector<2x8xf32> to vector<2xf32>
      %120 = vector.shape_cast %119 : vector<2xf32> to vector<2x1xf32>
      %121 = tpu.reciprocal %120 {approx = true} : vector<2x1xf32> -> vector<2x1xf32>
      %122 = vector.broadcast %121 : vector<2x1xf32> to vector<2x8xf32>
      %123 = arith.mulf %118, %122 : vector<2x8xf32>
      %124 = vector.shape_cast %123 : vector<2x8xf32> to vector<2x1x8xf32>
      %c0_67 = arith.constant 0 : index
      %c0_68 = arith.constant 0 : index
      %c0_69 = arith.constant 0 : index
      %125 = vector.load %arg6[%c0_67, %c0_68, %c0_69] : memref<2x8x64xf32, #tpu.memory_space<vmem>>, vector<2x8x64xf32>
      "tpu.trace_start"() <{level = 10 : i32, message = "bqs,bsc->bqc"}> : () -> ()
      %cst_70 = arith.constant dense<0.000000e+00> : vector<2x1x64xf32>
      %126 = tpu.matmul %124, %125, %cst_70 {dimension_numbers = #tpu.dot_dimension_numbers<[2], [1], [1], [2], [0, 0, 0, 1, 1, 2], [0], [0]>} : vector<2x1x8xf32>, vector<2x8x64xf32>, vector<2x1x64xf32> -> vector<2x1x64xf32>
      "tpu.trace_stop"() : () -> ()
      %127 = vector.shape_cast %126 : vector<2x1x64xf32> to vector<2x64xf32>
      %c0_71 = arith.constant 0 : index
      %c0_72 = arith.constant 0 : index
      %128 = vector.load %arg18[%c0_71, %c0_72] : memref<64x96xbf16, #tpu.memory_space<vmem>>, vector<64x96xbf16>
      %c0_73 = arith.constant 0 : index
      %c0_74 = arith.constant 0 : index
      %129 = vector.load %arg19[%c0_73, %c0_74] : memref<32x96xbf16, #tpu.memory_space<vmem>>, vector<32x96xbf16>
      %c0_75 = arith.constant 0 : index
      %c0_76 = arith.constant 0 : index
      %130 = vector.load %arg20[%c0_75, %c0_76] : memref<1x96xf32, #tpu.memory_space<vmem>>, vector<1x96xf32>
      %c0_77 = arith.constant 0 : index
      %c0_78 = arith.constant 0 : index
      %131 = vector.load %arg21[%c0_77, %c0_78] : memref<1x96xf32, #tpu.memory_space<vmem>>, vector<1x96xf32>
      %132 = arith.truncf %127 : vector<2x64xf32> to vector<2x64xbf16>
      %cst_79 = arith.constant dense<0.000000e+00> : vector<2x96xf32>
      %133 = tpu.matmul %132, %128, %cst_79 {dimension_numbers = #tpu.dot_dimension_numbers<[1], [0], [0], [1], [0, 0, 1, 1], [], []>} : vector<2x64xbf16>, vector<64x96xbf16>, vector<2x96xf32> -> vector<2x96xf32>
      %134 = vector.broadcast %130 : vector<1x96xf32> to vector<2x96xf32>
      %135 = arith.addf %133, %134 : vector<2x96xf32>
      %136 = arith.truncf %89 : vector<2x32xf32> to vector<2x32xbf16>
      %cst_80 = arith.constant dense<0.000000e+00> : vector<2x96xf32>
      %137 = tpu.matmul %136, %129, %cst_80 {dimension_numbers = #tpu.dot_dimension_numbers<[1], [0], [0], [1], [0, 0, 1, 1], [], []>} : vector<2x32xbf16>, vector<32x96xbf16>, vector<2x96xf32> -> vector<2x96xf32>
      %138 = vector.broadcast %131 : vector<1x96xf32> to vector<2x96xf32>
      %139 = arith.addf %137, %138 : vector<2x96xf32>
      %140 = vector.extract_strided_slice %135 {offsets = [0, 0], sizes = [2, 32], strides = [1, 1]} : vector<2x96xf32> to vector<2x32xf32>
      %141 = vector.extract_strided_slice %139 {offsets = [0, 0], sizes = [2, 32], strides = [1, 1]} : vector<2x96xf32> to vector<2x32xf32>
      %142 = arith.addf %140, %141 : vector<2x32xf32>
      %143 = arith.negf %142 : vector<2x32xf32>
      %144 = math.exp %143 : vector<2x32xf32>
      %cst_81 = arith.constant 1.000000e+00 : f32
      %145 = vector.broadcast %cst_81 : f32 to vector<2x32xf32>
      %146 = arith.addf %145, %144 : vector<2x32xf32>
      %147 = arith.divf %145, %146 : vector<2x32xf32>
      %148 = vector.extract_strided_slice %135 {offsets = [0, 32], sizes = [2, 32], strides = [1, 1]} : vector<2x96xf32> to vector<2x32xf32>
      %149 = vector.extract_strided_slice %139 {offsets = [0, 32], sizes = [2, 32], strides = [1, 1]} : vector<2x96xf32> to vector<2x32xf32>
      %150 = arith.addf %148, %149 : vector<2x32xf32>
      %151 = arith.negf %150 : vector<2x32xf32>
      %152 = math.exp %151 : vector<2x32xf32>
      %cst_82 = arith.constant 1.000000e+00 : f32
      %153 = vector.broadcast %cst_82 : f32 to vector<2x32xf32>
      %154 = arith.addf %153, %152 : vector<2x32xf32>
      %155 = arith.divf %153, %154 : vector<2x32xf32>
      %156 = vector.extract_strided_slice %135 {offsets = [0, 64], sizes = [2, 32], strides = [1, 1]} : vector<2x96xf32> to vector<2x32xf32>
      %157 = vector.extract_strided_slice %139 {offsets = [0, 64], sizes = [2, 32], strides = [1, 1]} : vector<2x96xf32> to vector<2x32xf32>
      %158 = arith.mulf %147, %157 : vector<2x32xf32>
      %159 = arith.addf %156, %158 : vector<2x32xf32>
      %160 = math.tanh %159 : vector<2x32xf32>
      %cst_83 = arith.constant 1.000000e+00 : f32
      %161 = vector.broadcast %cst_83 : f32 to vector<2x32xf32>
      %162 = arith.subf %161, %155 : vector<2x32xf32>
      %163 = arith.mulf %162, %160 : vector<2x32xf32>
      %164 = arith.mulf %155, %89 : vector<2x32xf32>
      %165 = arith.addf %163, %164 : vector<2x32xf32>
      %166 = tpu.concatenate %50, %165, %127 in 1 : vector<2x16xf32>, vector<2x32xf32>, vector<2x64xf32> -> vector<2x112xf32>
      %167 = arith.truncf %166 : vector<2x112xf32> to vector<2x112xbf16>
      %c0_84 = arith.constant 0 : index
      %c0_85 = arith.constant 0 : index
      %168 = vector.load %arg22[%c0_84, %c0_85] : memref<112x32xbf16, #tpu.memory_space<vmem>>, vector<112x32xbf16>
      %cst_86 = arith.constant dense<0.000000e+00> : vector<2x32xf32>
      %169 = tpu.matmul %167, %168, %cst_86 {dimension_numbers = #tpu.dot_dimension_numbers<[1], [0], [0], [1], [0, 0, 1, 1], [], []>} : vector<2x112xbf16>, vector<112x32xbf16>, vector<2x32xf32> -> vector<2x32xf32>
      %c0_87 = arith.constant 0 : index
      %c0_88 = arith.constant 0 : index
      %170 = vector.load %arg23[%c0_87, %c0_88] : memref<1x32xf32, #tpu.memory_space<vmem>>, vector<1x32xf32>
      %171 = vector.broadcast %170 : vector<1x32xf32> to vector<2x32xf32>
      %172 = arith.addf %169, %171 : vector<2x32xf32>
      %173 = math.tanh %172 : vector<2x32xf32>
      %c0_89 = arith.constant 0 : index
      %c0_90 = arith.constant 0 : index
      %174 = vector.load %arg27[%c0_89, %c0_90] : memref<2x32xf32, #tpu.memory_space<vmem>>, vector<2x32xf32>
      tpu.vector_store %arg27[%c0_89, %c0_90], %165 {strides = array<i32>} : memref<2x32xf32, #tpu.memory_space<vmem>>, vector<2x32xf32>,
      %c0_91 = arith.constant 0 : index
      %c0_92 = arith.constant 0 : index
      %175 = vector.load %arg28[%c0_91, %c0_92] : memref<2x32xf32, #tpu.memory_space<vmem>>, vector<2x32xf32>
      tpu.vector_store %arg28[%c0_91, %c0_92], %173 {strides = array<i32>} : memref<2x32xf32, #tpu.memory_space<vmem>>, vector<2x32xf32>,
      %cst_93 = arith.constant -1.000000e+30 : f32
      %176 = vector.broadcast %cst_93 : f32 to vector<2x1xf32>
      %c0_94 = arith.constant 0 : index
      %c0_95 = arith.constant 0 : index
      %177 = vector.load %arg29[%c0_94, %c0_95] : memref<2x1xf32, #tpu.memory_space<vmem>>, vector<2x1xf32>
      tpu.vector_store %arg29[%c0_94, %c0_95], %176 {strides = array<i32>} : memref<2x1xf32, #tpu.memory_space<vmem>>, vector<2x1xf32>,
      %cst_96 = arith.constant 0.000000e+00 : f32
      %178 = vector.broadcast %cst_96 : f32 to vector<2x1xf32>
      %c0_97 = arith.constant 0 : index
      %c0_98 = arith.constant 0 : index
      %179 = vector.load %arg30[%c0_97, %c0_98] : memref<2x1xf32, #tpu.memory_space<vmem>>, vector<2x1xf32>
      tpu.vector_store %arg30[%c0_97, %c0_98], %178 {strides = array<i32>} : memref<2x1xf32, #tpu.memory_space<vmem>>, vector<2x1xf32>,
      %cst_99 = arith.constant 0.000000e+00 : f32
      %180 = vector.broadcast %cst_99 : f32 to vector<2x1xf32>
      %c0_100 = arith.constant 0 : index
      %c0_101 = arith.constant 0 : index
      %181 = vector.load %arg31[%c0_100, %c0_101] : memref<2x1xf32, #tpu.memory_space<vmem>>, vector<2x1xf32>
      tpu.vector_store %arg31[%c0_100, %c0_101], %180 {strides = array<i32>} : memref<2x1xf32, #tpu.memory_space<vmem>>, vector<2x1xf32>,
    } else {
    }
    %c0 = arith.constant 0 : index
    %c0_4 = arith.constant 0 : index
    %8 = vector.load %arg28[%c0, %c0_4] : memref<2x32xf32, #tpu.memory_space<vmem>>, vector<2x32xf32>
    %9 = arith.truncf %8 : vector<2x32xf32> to vector<2x32xbf16>
    %c0_5 = arith.constant 0 : index
    %c0_6 = arith.constant 0 : index
    %10 = vector.load %arg24[%c0_5, %c0_6] : memref<32x128xbf16, #tpu.memory_space<vmem>>, vector<32x128xbf16>
    %cst = arith.constant dense<0.000000e+00> : vector<2x128xf32>
    %11 = tpu.matmul %9, %10, %cst {dimension_numbers = #tpu.dot_dimension_numbers<[1], [0], [0], [1], [0, 0, 1, 1], [], []>} : vector<2x32xbf16>, vector<32x128xbf16>, vector<2x128xf32> -> vector<2x128xf32>
    %c0_7 = arith.constant 0 : index
    %c0_8 = arith.constant 0 : index
    %12 = vector.load %arg25[%c0_7, %c0_8] : memref<1x128xf32, #tpu.memory_space<vmem>>, vector<1x128xf32>
    %13 = vector.broadcast %12 : vector<1x128xf32> to vector<2x128xf32>
    %14 = arith.addf %11, %13 : vector<2x128xf32>
    %cst_9 = arith.constant dense<0xFF800000> : vector<2xf32>
    %15 = vector.multi_reduction <maximumf>, %14, %cst_9 [1] : vector<2x128xf32> to vector<2xf32>
    %16 = vector.shape_cast %15 : vector<2xf32> to vector<2x1xf32>
    %c0_10 = arith.constant 0 : index
    %c0_11 = arith.constant 0 : index
    %17 = vector.load %arg29[%c0_10, %c0_11] : memref<2x1xf32, #tpu.memory_space<vmem>>, vector<2x1xf32>
    %18 = arith.maximumf %17, %16 : vector<2x1xf32>
    %c0_12 = arith.constant 0 : index
    %c0_13 = arith.constant 0 : index
    %19 = vector.load %arg30[%c0_12, %c0_13] : memref<2x1xf32, #tpu.memory_space<vmem>>, vector<2x1xf32>
    %20 = arith.subf %17, %18 : vector<2x1xf32>
    %21 = math.exp %20 : vector<2x1xf32>
    %22 = arith.mulf %19, %21 : vector<2x1xf32>
    %23 = vector.broadcast %18 : vector<2x1xf32> to vector<2x128xf32>
    %24 = arith.subf %14, %23 : vector<2x128xf32>
    %25 = math.exp %24 : vector<2x128xf32>
    %cst_14 = arith.constant dense<0.000000e+00> : vector<2xf32>
    %26 = vector.multi_reduction <add>, %25, %cst_14 [1] : vector<2x128xf32> to vector<2xf32>
    %27 = vector.shape_cast %26 : vector<2xf32> to vector<2x1xf32>
    %28 = arith.addf %22, %27 : vector<2x1xf32>
    %c0_15 = arith.constant 0 : index
    %c0_16 = arith.constant 0 : index
    %29 = vector.load %arg30[%c0_15, %c0_16] : memref<2x1xf32, #tpu.memory_space<vmem>>, vector<2x1xf32>
    tpu.vector_store %arg30[%c0_15, %c0_16], %28 {strides = array<i32>} : memref<2x1xf32, #tpu.memory_space<vmem>>, vector<2x1xf32>,
    %c0_17 = arith.constant 0 : index
    %c0_18 = arith.constant 0 : index
    %30 = vector.load %arg29[%c0_17, %c0_18] : memref<2x1xf32, #tpu.memory_space<vmem>>, vector<2x1xf32>
    tpu.vector_store %arg29[%c0_17, %c0_18], %18 {strides = array<i32>} : memref<2x1xf32, #tpu.memory_space<vmem>>, vector<2x1xf32>,
    %c128_i32 = arith.constant 128 : i32
    %31 = arith.muli %arg1, %c128_i32 : i32
    %32 = tpu.iota {dimensions = array<i32: 1>} : vector<2x128xi32>
    %33 = vector.broadcast %31 : i32 to vector<2x128xi32>
    %34 = arith.addi %33, %32 : vector<2x128xi32>
    %c0_19 = arith.constant 0 : index
    %c0_20 = arith.constant 0 : index
    %c0_21 = arith.constant 0 : index
    %35 = vector.load %arg3[%c0_19, %c0_20, %c0_21] : memref<1x2x1xi32, #tpu.memory_space<vmem>>, vector<1x2x1xi32>
    %36 = vector.shape_cast %35 : vector<1x2x1xi32> to vector<2x1xi32>
    %37 = vector.broadcast %36 : vector<2x1xi32> to vector<2x128xi32>
    %38 = arith.cmpi eq, %34, %37 : vector<2x128xi32>
    %c0_22 = arith.constant 0 : index
    %c0_23 = arith.constant 0 : index
    %39 = vector.load %arg31[%c0_22, %c0_23] : memref<2x1xf32, #tpu.memory_space<vmem>>, vector<2x1xf32>
    %cst_24 = arith.constant 0.000000e+00 : f32
    %40 = vector.broadcast %cst_24 : f32 to vector<2x128xf32>
    %41 = arith.select %38, %14, %40 : vector<2x128xi1>, vector<2x128xf32>
    %cst_25 = arith.constant dense<0.000000e+00> : vector<2xf32>
    %42 = vector.multi_reduction <add>, %41, %cst_25 [1] : vector<2x128xf32> to vector<2xf32>
    %43 = vector.shape_cast %42 : vector<2xf32> to vector<2x1xf32>
    %44 = arith.addf %39, %43 : vector<2x1xf32>
    %c0_26 = arith.constant 0 : index
    %c0_27 = arith.constant 0 : index
    %45 = vector.load %arg31[%c0_26, %c0_27] : memref<2x1xf32, #tpu.memory_space<vmem>>, vector<2x1xf32>
    tpu.vector_store %arg31[%c0_26, %c0_27], %44 {strides = array<i32>} : memref<2x1xf32, #tpu.memory_space<vmem>>, vector<2x1xf32>,
    %c0_i32_28 = arith.constant 0 : i32
    %46 = arith.cmpi eq, %arg1, %c0_i32_28 : i32
    %47 = arith.extui %46 : i1 to i32
    %c0_i32_29 = arith.constant 0 : i32
    %48 = arith.cmpi ne, %47, %c0_i32_29 : i32
    scf.if %48 {
      %c0_30 = arith.constant 0 : index
      %c0_31 = arith.constant 0 : index
      %49 = vector.load %arg29[%c0_30, %c0_31] : memref<2x1xf32, #tpu.memory_space<vmem>>, vector<2x1xf32>
      %c0_32 = arith.constant 0 : index
      %c0_33 = arith.constant 0 : index
      %50 = vector.load %arg30[%c0_32, %c0_33] : memref<2x1xf32, #tpu.memory_space<vmem>>, vector<2x1xf32>
      %51 = math.log %50 : vector<2x1xf32>
      %52 = arith.addf %49, %51 : vector<2x1xf32>
      %c0_34 = arith.constant 0 : index
      %c0_35 = arith.constant 0 : index
      %53 = vector.load %arg26[%c0_34, %c0_35] : memref<2x1xf32, #tpu.memory_space<vmem>>, vector<2x1xf32>
      %c0_36 = arith.constant 0 : index
      %c0_37 = arith.constant 0 : index
      %54 = vector.load %arg31[%c0_36, %c0_37] : memref<2x1xf32, #tpu.memory_space<vmem>>, vector<2x1xf32>
      %55 = arith.subf %52, %54 : vector<2x1xf32>
      %c0_38 = arith.constant 0 : index
      %c0_39 = arith.constant 0 : index
      %c0_40 = arith.constant 0 : index
      %56 = vector.load %arg4[%c0_38, %c0_39, %c0_40] : memref<1x2x1xf32, #tpu.memory_space<vmem>>, vector<1x2x1xf32>
      %57 = vector.shape_cast %56 : vector<1x2x1xf32> to vector<2x1xf32>
      %58 = arith.mulf %55, %57 : vector<2x1xf32>
      %59 = arith.addf %53, %58 : vector<2x1xf32>
      %c0_41 = arith.constant 0 : index
      %c0_42 = arith.constant 0 : index
      %60 = vector.load %arg26[%c0_41, %c0_42] : memref<2x1xf32, #tpu.memory_space<vmem>>, vector<2x1xf32>
      tpu.vector_store %arg26[%c0_41, %c0_42], %59 {strides = array<i32>} : memref<2x1xf32, #tpu.memory_space<vmem>>, vector<2x1xf32>,
    } else {
    }
    return
  }
  func.func @transform_0(%arg0: i32, %arg1: i32) -> (i32, i32, i32) {
    %c0_i32 = arith.constant 0 : i32
    %c0_i32_0 = arith.constant 0 : i32
    %c0_i32_1 = arith.constant 0 : i32
    return %arg0, %c0_i32, %c0_i32_0 : i32, i32, i32
  }
  func.func @transform_1(%arg0: i32, %arg1: i32) -> (i32, i32, i32) {
    %c0_i32 = arith.constant 0 : i32
    %c0_i32_0 = arith.constant 0 : i32
    %c0_i32_1 = arith.constant 0 : i32
    return %arg0, %c0_i32, %c0_i32_0 : i32, i32, i32
  }
  func.func @transform_2(%arg0: i32, %arg1: i32) -> (i32, i32, i32) {
    %c0_i32 = arith.constant 0 : i32
    %c0_i32_0 = arith.constant 0 : i32
    %c0_i32_1 = arith.constant 0 : i32
    return %arg0, %c0_i32, %c0_i32_0 : i32, i32, i32
  }
  func.func @transform_3(%arg0: i32, %arg1: i32) -> (i32, i32) {
    %c0_i32 = arith.constant 0 : i32
    %c0_i32_0 = arith.constant 0 : i32
    %c0_i32_1 = arith.constant 0 : i32
    return %c0_i32, %c0_i32_0 : i32, i32
  }
  func.func @transform_4(%arg0: i32, %arg1: i32) -> (i32, i32, i32) {
    %c0_i32 = arith.constant 0 : i32
    %c0_i32_0 = arith.constant 0 : i32
    %c0_i32_1 = arith.constant 0 : i32
    %c0_i32_2 = arith.constant 0 : i32
    return %c0_i32, %c0_i32_0, %c0_i32_1 : i32, i32, i32
  }
  func.func @transform_5(%arg0: i32, %arg1: i32) -> (i32, i32, i32) {
    %c0_i32 = arith.constant 0 : i32
    %c0_i32_0 = arith.constant 0 : i32
    %c0_i32_1 = arith.constant 0 : i32
    %c0_i32_2 = arith.constant 0 : i32
    return %c0_i32, %c0_i32_0, %c0_i32_1 : i32, i32, i32
  }
  func.func @transform_6(%arg0: i32, %arg1: i32) -> (i32, i32) {
    %c0_i32 = arith.constant 0 : i32
    %c0_i32_0 = arith.constant 0 : i32
    %c0_i32_1 = arith.constant 0 : i32
    return %c0_i32, %c0_i32_0 : i32, i32
  }
  func.func @transform_7(%arg0: i32, %arg1: i32) -> (i32, i32) {
    %c0_i32 = arith.constant 0 : i32
    %c0_i32_0 = arith.constant 0 : i32
    %c0_i32_1 = arith.constant 0 : i32
    return %c0_i32, %c0_i32_0 : i32, i32
  }
  func.func @transform_8(%arg0: i32, %arg1: i32) -> (i32, i32) {
    %c0_i32 = arith.constant 0 : i32
    %c0_i32_0 = arith.constant 0 : i32
    %c0_i32_1 = arith.constant 0 : i32
    return %c0_i32, %c0_i32_0 : i32, i32
  }
  func.func @transform_9(%arg0: i32, %arg1: i32) -> (i32, i32) {
    %c0_i32 = arith.constant 0 : i32
    %c0_i32_0 = arith.constant 0 : i32
    %c0_i32_1 = arith.constant 0 : i32
    return %c0_i32, %c0_i32_0 : i32, i32
  }
  func.func @transform_10(%arg0: i32, %arg1: i32) -> (i32, i32) {
    %c0_i32 = arith.constant 0 : i32
    %c0_i32_0 = arith.constant 0 : i32
    %c0_i32_1 = arith.constant 0 : i32
    return %c0_i32, %c0_i32_0 : i32, i32
  }
  func.func @transform_11(%arg0: i32, %arg1: i32) -> (i32, i32) {
    %c0_i32 = arith.constant 0 : i32
    %c0_i32_0 = arith.constant 0 : i32
    %c0_i32_1 = arith.constant 0 : i32
    return %c0_i32, %c0_i32_0 : i32, i32
  }
  func.func @transform_12(%arg0: i32, %arg1: i32) -> (i32, i32) {
    %c0_i32 = arith.constant 0 : i32
    %c0_i32_0 = arith.constant 0 : i32
    %c0_i32_1 = arith.constant 0 : i32
    return %c0_i32, %c0_i32_0 : i32, i32
  }
  func.func @transform_13(%arg0: i32, %arg1: i32) -> (i32, i32) {
    %c0_i32 = arith.constant 0 : i32
    %c0_i32_0 = arith.constant 0 : i32
    %c0_i32_1 = arith.constant 0 : i32
    return %c0_i32, %c0_i32_0 : i32, i32
  }
  func.func @transform_14(%arg0: i32, %arg1: i32) -> (i32, i32) {
    %c0_i32 = arith.constant 0 : i32
    %c0_i32_0 = arith.constant 0 : i32
    %c0_i32_1 = arith.constant 0 : i32
    return %c0_i32, %c0_i32_0 : i32, i32
  }
  func.func @transform_15(%arg0: i32, %arg1: i32) -> (i32, i32) {
    %c0_i32 = arith.constant 0 : i32
    %c0_i32_0 = arith.constant 0 : i32
    %c0_i32_1 = arith.constant 0 : i32
    return %c0_i32, %c0_i32_0 : i32, i32
  }
  func.func @transform_16(%arg0: i32, %arg1: i32) -> (i32, i32) {
    %c0_i32 = arith.constant 0 : i32
    %c0_i32_0 = arith.constant 0 : i32
    %c0_i32_1 = arith.constant 0 : i32
    return %c0_i32, %c0_i32_0 : i32, i32
  }
  func.func @transform_17(%arg0: i32, %arg1: i32) -> (i32, i32) {
    %c0_i32 = arith.constant 0 : i32
    %c0_i32_0 = arith.constant 0 : i32
    %c0_i32_1 = arith.constant 0 : i32
    return %c0_i32, %c0_i32_0 : i32, i32
  }
  func.func @transform_18(%arg0: i32, %arg1: i32) -> (i32, i32) {
    %c0_i32 = arith.constant 0 : i32
    %c0_i32_0 = arith.constant 0 : i32
    %c0_i32_1 = arith.constant 0 : i32
    return %c0_i32, %c0_i32_0 : i32, i32
  }
  func.func @transform_19(%arg0: i32, %arg1: i32) -> (i32, i32) {
    %c0_i32 = arith.constant 0 : i32
    %c0_i32_0 = arith.constant 0 : i32
    %c0_i32_1 = arith.constant 0 : i32
    return %c0_i32, %c0_i32_0 : i32, i32
  }
  func.func @transform_20(%arg0: i32, %arg1: i32) -> (i32, i32) {
    %c0_i32 = arith.constant 0 : i32
    %c0_i32_0 = arith.constant 0 : i32
    %c0_i32_1 = arith.constant 0 : i32
    return %c0_i32, %c0_i32_0 : i32, i32
  }
  func.func @transform_21(%arg0: i32, %arg1: i32) -> (i32, i32) {
    %c0_i32 = arith.constant 0 : i32
    %c0_i32_0 = arith.constant 0 : i32
    %c0_i32_1 = arith.constant 0 : i32
    return %c0_i32, %c0_i32_0 : i32, i32
  }
  func.func @transform_22(%arg0: i32, %arg1: i32) -> (i32, i32) {
    %c0_i32 = arith.constant 0 : i32
    %c0_i32_0 = arith.constant 0 : i32
    return %c0_i32, %arg1 : i32, i32
  }
  func.func @transform_23(%arg0: i32, %arg1: i32) -> (i32, i32) {
    %c0_i32 = arith.constant 0 : i32
    %c0_i32_0 = arith.constant 0 : i32
    return %c0_i32, %arg1 : i32, i32
  }
  func.func @transform_24(%arg0: i32, %arg1: i32) -> (i32, i32) {
    %c0_i32 = arith.constant 0 : i32
    %c0_i32_0 = arith.constant 0 : i32
    %c0_i32_1 = arith.constant 0 : i32
    return %c0_i32, %c0_i32_0 : i32, i32
  }
}

</mosaic_0001>

<bundles_post_ra>
// kernel: rnnsearch_forward.2
= control target key start
LH: loop header
LB: loop body
LE: loop exit
PB: predicated region body
PF: predicated region fallthrough
CT: control target
= control target key end

     0   :  { %s1125_s21 = smov 0   ;;  %s1239_s0 = inlined_call_operand.vmem [shape: f32[8,2,16], index: 0, kind: input, shape index: {}, may-alias: {0,1}]   ;;  %s1240_s1 = inlined_call_operand.vmem [shape: f32[8,2,16], index: 1, kind: input, shape index: {}, may-alias: {0,1}]   ;;  %s1241_s2 = inlined_call_operand.vmem [shape: f32[8,2,1], index: 2, kind: input, shape index: {}]   ;;  %s1242_s3 = inlined_call_operand.vmem [shape: bf16[16,96], index: 3, kind: input, shape index: {}]   ;;  %s1243_s4 = inlined_call_operand.vmem [shape: bf16[32,96], index: 4, kind: input, shape index: {}]   ;;  %s1244_s5 = inlined_call_operand.vmem [shape: f32[1,96], index: 5, kind: input, shape index: {}]   ;;  %s1245_s6 = inlined_call_operand.vmem [shape: f32[1,96], index: 6, kind: input, shape index: {}]   ;;  %s1246_s7 = inlined_call_operand.vmem [shape: bf16[16,96], index: 7, kind: input, shape index: {}]   ;;  %s1247_s8 = inlined_call_operand.vmem [shape: bf16[32,96], index: 8, kind: input, shape index: {}]   ;;  %s1248_s9 = inlined_call_operand.vmem [shape: f32[1,96], index: 9, kind: input, shape index: {}]   ;;  %s1249_s10 = inlined_call_operand.vmem [shape: f32[1,96], index: 10, kind: input, shape index: {}]   ;;  %s1250_s11 = inlined_call_operand.vmem [shape: f32[8,2,32], index: 11, kind: output, shape index: {0}]   ;;  %s1251_s12 = inlined_call_operand.vmem [shape: f32[8,2,32], index: 12, kind: output, shape index: {1}]  }
   0x1 LB: > { %1253 = sst [smem:[#allocation4_spill]] %s1051_s21  ;;  %s1131_s22 = sadd.s32 4294967295, %s1051_s21   ;;  %s1051_s21 = sphi %s1125_s21, %s23_s21  }
   0x2   : > { %p946_p0 = scmp.ge.s32.totalorder %s1051_s21, 1  ;;  %p379_p1 = scmp.lt.s32.totalorder %s1051_s21, 9 }
   0x4   : > { %p380_p2 = pnand %p946_p0, %p379_p1 }
   0x5   : > { %p429_p3 = scmp.lt.s32.totalorder (!%p380_p2), %s1131_s22, 7  ;;  %s1137_s23 = ssub.s32 (!%p380_p2), 7, %s1131_s22 }
   0x6   : > { %383 = sbr.rel (%p380_p2) target bundleno = 721 (0x2d1), region = 64  ;;  %p434_p4 = scmp.lt.s32.totalorder (!%p380_p2), %s1137_s23, 7 }
   0x7   : > { %p951_p5 = scmp.ne.s32.totalorder (!%p380_p2), %s1131_s22, 0 }
   0xb   : > { %s430_s24 = scalar_select %p429_p3, %s1131_s22, 7 }
   0xc   : > { %s435_s25 = scalar_select %p434_p4, %s1137_s23, 7 }
   0xd   : > { %s947_s26 = sshll.u32 %s430_s24, 1  ;;  %453 = sbr.rel (%p951_p5) target bundleno = 20 (0x14), region = 68 }
   0xe   : > { %s432_s29 = scalar_lea.vmem %s1239_s0, %s947_s26  ;;  %s948_s30 = sshll.u32 %s435_s25, 1 }
   0xf   : > { %s1148_s15 = scalar_lea.vmem %s1240_s1, %s948_s30  ;;  %s1153_s18 = scalar_lea.vmem %s1250_s11, %s947_s26 }
  0x10   : > { %s1158_s21 = scalar_lea.vmem %s1251_s12, %s948_s30 }
  0x12   : > { %vm454_vm0 = vcmask 254976   ;;  %v1053_v0 = vmov 0.0  }
  0x13   : > { %455 = vst.msk [vmem:[#allocation2] sm:$0x3] %vm454_vm0, %v1053_v0  ;;  %456 = vst.msk [vmem:[#allocation3] sm:$0x3] %vm454_vm0, %v1053_v0 }
  0x14 PF: > { %v1027_v1 = vld [vmem:[%s1243_s4 + $0x8] sm:$0xff]   ;;  %v1054_v2 = vmov 0.0   ;;  %v1028_v3 = vld [vmem:[%s1243_s4] sm:$0xff]   ;;  %vm1055_vm1 = vmmov 0   ;;  %vm483_vm2 = vcmask 130048   ;;  %vm546_vm3 = vcmask 261120  }
  0x15   : > { %988 = vmatprep.subr.bf16.mxu1 %v1054_v2  ;;  %982 = vmatprep.subr.bf16.mxu0 %v1054_v2  ;;  %v1029_v4 = vld [vmem:[%s1242_s3] sm:$0xff]   ;;  %v1030_v9 = vld [vmem:[%s1247_s8 + $0x8] sm:$0xff]   ;;  %v1056_v16 = vmov 0   ;;  %s952_s24 = sshll.u32 %s1131_s22, 1  ;;  %s1057_s25 = smov 64   ;;  %vm630_vm4 = vcmask 254976  }
  0x16   : > { %989 = vmatpush3.bf16.msra.mxu1 %v1027_v1  ;;  %992 = vmatprep.mubr.msk.bf16.mxu1 %vm1055_vm1, %v1054_v2  ;;  %v457_v6 = vld [vmem:[%s432_s29] sm:$0x3]  ;;  %s459_s28 = scalar_lea.vmem %s1241_s2, %s952_s24  ;;  %s961_s22 = sshll.u32 %s1137_s23, 1 }
  0x17   : > { %990 = vmatprep.subr.bf16.mxu1 %v1054_v2  ;;  %984 = vmatprep.mubr.msk.bf16.mxu0 %vm1055_vm1, %v1054_v2  ;;  %v470_v7 = vpack.c.bf16 %v457_v6, %v457_v6  ;;  %v1032_v10 = vld [vmem:[%s1246_s7] sm:$0xff]   ;;  %s652_s17 = scalar_lea.vmem %s1241_s2, %s961_s22  ;;  %s1058_s29 = smov 32  }
  0x18   : > { %983 = vmatpush3.bf16.msra.mxu0 %v1029_v4  ;;  %v649_v11 = vld [vmem:[%s1148_s15] sm:$0x3]  ;;  %1025 = vset.pattern.permute.xlu0 %v1056_v16  ;;  %s1059_s24 = smov 96  }
  0x19   : > { %996 = vmatprep.subr.bf16.mxu0 %v1054_v2  ;;  %v1031_v12 = vld [vmem:[%s1247_s8] sm:$0xff]   ;;  %v663_v14 = vpack.c.bf16 %v649_v11, %v649_v11  ;;  %1026 = vset.pattern.permute.xlu1 %v1056_v16 }
  0x1a   : > { %v1172_v5 = vld [vmem:[#allocation2] sm:$0x3]  ;;  %991 = vmatpush3.bf16.msra.mxu1 %v1028_v3  ;;  %v1190_v13 = vld [vmem:[#allocation3] sm:$0x3] }
  0x1b   : > { %v527_v8 = vpack.c.bf16 %v1172_v5, %v1172_v5  ;;  %1002 = vmatprep.subr.bf16.mxu1 %v1054_v2  ;;  %985 = vmatmul.mubr.msk.bf16.vlgmr.msra.gmra.mxu0 %vm483_vm2, %v470_v7  ;;  %v719_v15 = vpack.c.bf16 %v1190_v13, %v1190_v13  ;;  %v956_v17 = vld [vmem:[%s1245_s6] ss:$0 sm:$0xff] }
  0x1c   : > { %997 = vmatpush3.bf16.msra.mxu0 %v1032_v10  ;;  %998 = vmatprep.mubr.msk.bf16.mxu0 %vm1055_vm1, %v1054_v2  ;;  %v965_v27 = vld [vmem:[%s1249_s10] ss:$0 sm:$0xff] }
  0x1d   : > { %993 = vmatmul.mubr.msk.bf16.vlgmr.msra.gmra.mxu1 %vm546_vm3, %v527_v8  ;;  %v460_v30 = vld [vmem:[%s459_s28] sm:$0x3] }
  0x1e   : > { %1003 = vmatpush3.bf16.msra.mxu1 %v1030_v9  ;;  %1006 = vmatprep.mubr.msk.bf16.mxu1 %vm1055_vm1, %v1054_v2  ;;  %v632_v35 = vsub.f32 1.0, %v460_v30  ;;  %v653_v39 = vld [vmem:[%s652_s17] sm:$0x3] }
  0x1f   : > { %1004 = vmatprep.subr.bf16.mxu1 %v1054_v2  ;;  %v953_v40 = vld [vmem:[%s1244_s5] ss:$0 sm:$0xff]  ;;  %v822_v58 = vsub.f32 1.0, %v653_v39 }
  0x20   : > { %v962_v43 = vld [vmem:[%s1248_s9] ss:$0 sm:$0xff] }
  0x22   : > { %1005 = vmatpush3.bf16.msra.mxu1 %v1031_v12 }
  0x23   : > { %999 = vmatmul.mubr.msk.bf16.vlgmr.msra.gmra.mxu0 %vm483_vm2, %v663_v14 }
  0x25   : > { %1007 = vmatmul.mubr.msk.bf16.vlgmr.msra.gmra.mxu1 %vm546_vm3, %v719_v15 }
  0xdb   : > { %v521_v18 = vpop.f32.mrf.mxu0 }
  0xdc   : > { %v522_v41 = vadd.f32 %v953_v40, %v521_v18 }
  0xdd   : > { %v584_v19 = vpop.f32.mrf.mxu1  ;;  %v986_v20 = vpop.f32.mrf.mxu0 }
  0xde   : > { %v585_v21 = vadd.f32 %v956_v17, %v584_v19 }
  0xdf   : > { %v994_v22 = vpop.f32.mrf.mxu1  ;;  %v524_v23 = vpop.f32.mrf.mxu0 }
  0xe0   : > { %598 = vrot.lane.b32.xlu0 %v585_v21, %s1057_s25  ;;  %v590_v42 = vadd.f32 %v585_v21, %v522_v41 }
  0xe1   : > { %v587_v24 = vpop.f32.mrf.mxu1  ;;  %v987_v25 = vpop.f32.mrf.mxu0 }
  0xe2   : > { %v960_v44 = vmul.f32 -1.442695, %v590_v42 }
  0xe3   : > { %v995_v26 = vpop.f32.mrf.mxu1  ;;  %v713_v28 = vpop.f32.mrf.mxu0 }
  0xe4   : > { %v714_v45 = vadd.f32 %v962_v43, %v713_v28  ;;  %1033 = vpow2.f32 %v960_v44 }
  0xe5   : > { %v775_v29 = vpop.f32.mrf.mxu1  ;;  %v1000_v31 = vpop.f32.mrf.mxu0 }
  0xe6   : > { %v776_v32 = vadd.f32 %v965_v27, %v775_v29 }
  0xe7   : > { %v1008_v33 = vpop.f32.mrf.mxu1  ;;  %v716_v34 = vpop.f32.mrf.mxu0 }
  0xe8   : > { %789 = vrot.lane.b32.xlu0 %v776_v32, %s1057_s25  ;;  %v781_v46 = vadd.f32 %v776_v32, %v714_v45 }
  0xe9   : > { %v778_v36 = vpop.f32.mrf.mxu1  ;;  %v1001_v37 = vpop.f32.mrf.mxu0 }
  0xea   : > { %v969_v47 = vmul.f32 -1.442695, %v781_v46 }
  0xeb   : > { %v1009_v38 = vpop.f32.mrf.mxu1 }
  0xec   : > { %635 = vperm.xlu0 %1025, %v632_v35   ;;  %1035 = vpow2.f32 %v969_v47 }
  0xf0   : > { %813 = vperm.xlu0 %1025, %v653_v39  }
  0xf1   : > { %v1034_v48 = vpop.eup %1033 }
  0xf2   : > { %v594_v49 = vadd.f32 1.0, %v1034_v48 }
  0xf4   : > { %615 = vrot.lane.b32.xlu0 %v1172_v5, %s1058_s29  ;;  %1037 = vrcp.f32 %v594_v49 }
  0xf8   : > { %806 = vrot.lane.b32.xlu0 %v1190_v13, %s1058_s29 }
  0xf9   : > { %v1036_v50 = vpop.eup %1035 }
  0xfa   : > { %v785_v51 = vadd.f32 1.0, %v1036_v50 }
  0xfc   : > { %1039 = vrcp.f32 %v785_v51 }
 0x101   : > { %v1038_v52 = vpop.eup %1037 }
 0x102   : > { %v608_v9 = vsub.f32 1.0, %v1038_v52 }
 0x109   : > { %v1040_v55 = vpop.eup %1039 }
 0x10a   : > { %v799_v16 = vsub.f32 1.0, %v1040_v55 }
 0x152   : > { %v599_v53 = vpop.permute.xlu0 %598 }
 0x153   : > { %v601_v54 = vmul.f32 %v1038_v52, %v599_v53 }
 0x155   : > { %603 = vrot.lane.b32.xlu1 %v601_v54, %s1057_s25 }
 0x15a   : > { %v790_v56 = vpop.permute.xlu0 %789 }
 0x15b   : > { %v792_v57 = vmul.f32 %v1040_v55, %v790_v56 }
 0x15d   : > { %794 = vrot.lane.b32.xlu1 %v792_v57, %s1057_s25 }
 0x161   : > { %825 = vperm.xlu1 %1026, %v822_v58  }
 0x165   : > { %622 = vperm.xlu1 %1026, %v460_v30  }
 0x167   : > { %v636_v3 = vpop.permute.xlu0 %635 }
 0x168   : > { %v638_v4 = vmul.f32 %v636_v3, %v1172_v5 }
 0x16b   : > { %v814_v6 = vpop.permute.xlu0 %813 }
 0x16f   : > { %v616_v8 = vpop.permute.xlu0 %615 }
 0x170   : > { %v618_v11 = vmul.f32 %v1038_v52, %v616_v8 }
 0x1c7   : > { %v604_v59 = vpop.permute.xlu1 %603 }
 0x1c8   : > { %v606_v60 = vadd.f32 %v604_v59, %v522_v41 }
 0x1ca   : > { %1041 = vtanh.f32 %v606_v60 }
 0x1cf   : > { %v795_v61 = vpop.permute.xlu1 %794 }
 0x1d0   : > { %v797_v62 = vadd.f32 %v795_v61, %v714_v45 }
 0x1d2   : > { %1043 = vtanh.f32 %v797_v62 }
 0x1d7   : > { %v1042_v63 = vpop.eup %1041 }
 0x1d8   : > { %610 = vrot.lane.b32.xlu1 %v1042_v63, %s1059_s24 }
 0x1dc   : > { %v826_v0 = vpop.permute.xlu1 %825 }
 0x1dd   : > { %v828_v1 = vmul.f32 %v826_v0, %v1190_v13  ;;  %v807_v13 = vpop.permute.xlu0 %806 }
 0x1de   : > { %v809_v5 = vmul.f32 %v1040_v55, %v807_v13 }
 0x1df   : > { %v1044_v2 = vpop.eup %1043  ;;  %830 = vrot.lane.b32.xlu0 %v828_v1, %s1058_s29 }
 0x1e0   : > { %801 = vrot.lane.b32.xlu1 %v1044_v2, %s1059_s24  ;;  %v623_v7 = vpop.permute.xlu1 %622 }
 0x1e4   : > { %640 = vrot.lane.b32.xlu1 %v638_v4, %s1058_s29 }
 0x24a   : > { %v611_v10 = vpop.permute.xlu1 %610 }
 0x24b   : > { %v613_v12 = vmul.f32 %v611_v10, %v608_v9 }
 0x24d   : > { %v619_v14 = vadd.f32 %v618_v11, %v613_v12 }
 0x24f   : > { %v625_v15 = vmul.f32 %v623_v7, %v619_v14 }
 0x251   : > { %627 = vrot.lane.b32.xlu1 %v625_v15, %s1059_s24  ;;  %v831_v23 = vpop.permute.xlu0 %830 }
 0x252   : > { %v802_v17 = vpop.permute.xlu1 %801 }
 0x253   : > { %v804_v18 = vmul.f32 %v802_v17, %v799_v16 }
 0x255   : > { %v810_v19 = vadd.f32 %v809_v5, %v804_v18 }
 0x256   : > { %v641_v20 = vpop.permute.xlu1 %640 }
 0x257   : > { %v643_v21 = vadd.f32 %v641_v20, %v625_v15  ;;  %v816_v22 = vmul.f32 %v814_v6, %v810_v19 }
 0x259   : > { %818 = vrot.lane.b32.xlu1 %v816_v22, %s1059_s24  ;;  %645 = vrot.lane.b32.xlu0 %v643_v21, %s1059_s24  ;;  %v833_v24 = vadd.f32 %v831_v23, %v816_v22 }
 0x25d   : > { %835 = vrot.lane.b32.xlu0 %v833_v24, %s1059_s24 }
 0x2c3   : > { %v628_v25 = vpop.permute.xlu1 %627 }
 0x2c4   : > { %631 = vst.msk [vmem:[%s1153_s18] sm:$0x3] %vm630_vm4, %v628_v25 }
 0x2cb   : > { %v646_v26 = vpop.permute.xlu0 %645  ;;  %v819_v27 = vpop.permute.xlu1 %818 }
 0x2cc   : > { %648 = vst.msk [vmem:[#allocation2] sm:$0x3] %vm630_vm4, %v646_v26  ;;  %821 = vst.msk [vmem:[%s1158_s21] sm:$0x3] %vm630_vm4, %v819_v27 }
 0x2cf   : > { %v836_v28 = vpop.permute.xlu0 %835 }
 0x2d0   : > { %838 = vst.msk [vmem:[#allocation3] sm:$0x3] %vm630_vm4, %v836_v28 }
 0x2d1 PF: > { %s1254_s25 = sld [smem:[#allocation4_spill]] }
 0x2d7   : > { %s23_s21 = sadd.s32 1, %s1254_s25  }
 0x2d8   : > { %p20_p6 = scmp.ge.s32.totalorder %s23_s21, 10  }
 0x2da   :  { %22 = sbr.rel (!%p20_p6) target bundleno = 1 (0x1), region = 115 }

// kernel: rnnsearch_forward.3
= control target key start
LH: loop header
LB: loop body
LE: loop exit
PB: predicated region body
PF: predicated region fallthrough
CT: control target
= control target key end

     0   :  { %s2402_s27 = smov 0   ;;  %s2404_s28 = smov 0   ;;  %s2699_s0 = inlined_call_operand.vmem [shape: f32[7,2,16], index: 0, kind: input, shape index: {}]   ;;  %s2700_s1 = inlined_call_operand.vmem [shape: s32[7,2,1], index: 1, kind: input, shape index: {}]   ;;  %s2701_s2 = inlined_call_operand.vmem [shape: f32[7,2,1], index: 2, kind: input, shape index: {}]   ;;  %s2702_s3 = inlined_call_operand.vmem [shape: f32[2,8], index: 3, kind: input, shape index: {}]   ;;  %s2703_s4 = inlined_call_operand.vmem [shape: f32[2,8,64], index: 4, kind: input, shape index: {}]   ;;  %s2704_s5 = inlined_call_operand.vmem [shape: f32[2,8,32], index: 5, kind: input, shape index: {}]   ;;  %s2705_s6 = inlined_call_operand.vmem [shape: bf16[64,32], index: 6, kind: input, shape index: {}]   ;;  %s2706_s7 = inlined_call_operand.vmem [shape: f32[1,32], index: 7, kind: input, shape index: {}]   ;;  %s2707_s8 = inlined_call_operand.vmem [shape: bf16[16,96], index: 8, kind: input, shape index: {}]   ;;  %s2708_s9 = inlined_call_operand.vmem [shape: bf16[32,96], index: 9, kind: input, shape index: {}]   ;;  %s2709_s10 = inlined_call_operand.vmem [shape: f32[1,96], index: 10, kind: input, shape index: {}]   ;;  %s2710_s11 = inlined_call_operand.vmem [shape: f32[1,96], index: 11, kind: input, shape index: {}]   ;;  %s2711_s12 = inlined_call_operand.vmem [shape: bf16[32,32], index: 12, kind: input, shape index: {}]   ;;  %s2712_s13 = inlined_call_operand.vmem [shape: f32[1,32], index: 13, kind: input, shape index: {}]   ;;  %s2713_s14 = inlined_call_operand.vmem [shape: f32[1,32], index: 14, kind: input, shape index: {}]   ;;  %s2714_s15 = inlined_call_operand.<no memory space> [shape: f32[1,1], index: 15, kind: input, shape index: {}]   ;;  %s2715_s16 = inlined_call_operand.vmem [shape: bf16[64,96], index: 16, kind: input, shape index: {}]   ;;  %s2716_s17 = inlined_call_operand.vmem [shape: bf16[32,96], index: 17, kind: input, shape index: {}]   ;;  %s2717_s18 = inlined_call_operand.vmem [shape: f32[1,96], index: 18, kind: input, shape index: {}]   ;;  %s2718_s19 = inlined_call_operand.vmem [shape: f32[1,96], index: 19, kind: input, shape index: {}]   ;;  %s2719_s20 = inlined_call_operand.vmem [shape: bf16[112,32], index: 20, kind: input, shape index: {}]   ;;  %s2720_s21 = inlined_call_operand.vmem [shape: f32[1,32], index: 21, kind: input, shape index: {}]   ;;  %s2721_s22 = inlined_call_operand.vmem [shape: bf16[32,128], index: 22, kind: input, shape index: {}]   ;;  %s2722_s23 = inlined_call_operand.vmem [shape: f32[1,128], index: 23, kind: input, shape index: {}]   ;;  %s2723_s24 = inlined_call_operand.vmem [shape: f32[2,1], index: 24, kind: output, shape index: {}]  }
   0x1   :  { %2730 = sst [smem:[#allocation11_spill]] %s2699_s0  ;;  %v29_v0 = vstv %s2714_s15 }
   0x2   :  { %2731 = sst [smem:[#allocation12_spill]] %s2700_s1  ;;  %30 = vst [vmem:[#allocation7] sm:$0x1] %v29_v0 }
   0x3   :  { %2732 = sst [smem:[#allocation13_spill]] %s2701_s2 }
   0x4   :  { %2733 = sst [smem:[#allocation14_spill]] %s2702_s3 }
   0x5   :  { %2734 = sst [smem:[#allocation15_spill]] %s2703_s4 }
   0x6   :  { %2735 = sst [smem:[#allocation16_spill]] %s2704_s5 }
   0x7   :  { %2736 = sst [smem:[#allocation17_spill]] %s2705_s6  ;;  %s2406_s6 = smov 0  }
   0x8   :  { %2737 = sst [smem:[#allocation18_spill]] %s2706_s7 }
   0x9   :  { %2738 = sst [smem:[#allocation19_spill]] %s2707_s8 }
   0xa   :  { %2739 = sst [smem:[#allocation20_spill]] %s2722_s23 }
   0xb LB: > { %2740 = sst [smem:[#allocation8_spill]] %s2256_s28  ;;  %s48_s15 = sadd.s32 1, %s2256_s28  ;;  %s2260_s6 = sphi %s2406_s6, %s36_s6   ;;  %s2256_s28 = sphi %s2404_s28, %s2761_s28   ;;  %s2252_s27 = sphi %s2402_s27, %s2760_s27  }
   0xc   : > { %2741 = sst [smem:[#allocation9_spill]] %s2260_s6  ;;  %p1965_p0 = scmp.ge.s32.totalorder %s2260_s6, 1 }
   0xd   : > { %p50_p1 = scmp.ge.s32.totalorder %s48_s15, 7  ;;  %p705_p2 = scmp.lt.s32.totalorder %s2260_s6, 8 }
   0xf   : > { %s2763_s15 = smov (%p50_p1, %s48_s15), 0  ;;  %p706_p3 = pnand %p1965_p0, %p705_p2 }
  0x10   : > { %2742 = sst [smem:[#allocation10_spill]] %s2763_s15  ;;  %p780_p4 = scmp.lt.s32.totalorder (!%p706_p3), %s2252_s27, 6 }
  0x11   : > { %709 = sbr.rel (%p706_p3) target bundleno = 3467 (0xd8b), region = 116  ;;  %p800_p5 = scmp.eq.s32.totalorder (!%p706_p3), %s2252_s27, 0 }
  0x12   : > { %s2743_s7 = sld [smem:[#allocation11_spill]] (!%p706_p3) }
  0x13   : > { %s2744_s8 = sld [smem:[#allocation12_spill]] (!%p706_p3) }
  0x14   : > { %s2745_s26 = sld [smem:[#allocation13_spill]] (!%p706_p3) }
  0x16   : > { %s2765_s27 = smov (!%p780_p4, %s2252_s27), 6  ;;  %805 = sbr.rel (!%p800_p5) target bundleno = 406 (0x196), region = 120  ;;  %vm809_vm0 = vcmask (%p800_p5), 58368   ;;  %v2262_v4 = vmov (%p800_p5), 0.0   ;;  %vm930_vm1 = vcmask (%p800_p5), 1024   ;;  %vm2263_vm2 = vmmov (%p800_p5), 0  }
  0x17   : > { %s2420_s2 = sshll.u32 %s2765_s27, 1  ;;  %s2746_s27 = sld [smem:[#allocation14_spill]] (%p800_p5)  ;;  %2055 = vmatprep.subr.bf16.mxu0 (%p800_p5), %v2262_v4  ;;  %931 = vst.msk [vmem:[%s2723_s24] sm:$0x3] (%p800_p5), %vm930_vm1, %v2262_v4  ;;  %2063 = vmatprep.mubr.msk.bf16.mxu0 (%p800_p5), %vm2263_vm2, %v2262_v4  ;;  %vm813_vm3 = vcmask (%p800_p5), 523264   ;;  %vm857_vm4 = vcmask (%p800_p5), 1041409  }
  0x18   : > { %s783_s30 = scalar_lea.vmem %s2743_s7, %s2420_s2  ;;  %s2747_s23 = sld [smem:[#allocation17_spill]] (%p800_p5)  ;;  %vm928_vm5 = vcmask (%p800_p5), 254976  }
  0x19   : > { %s787_s4 = scalar_lea.vmem %s2744_s8, %s2420_s2  ;;  %s2748_s29 = sld [smem:[#allocation15_spill]] (%p800_p5) }
  0x1a   : > { %s791_s15 = scalar_lea.vmem %s2745_s26, %s2420_s2  ;;  %s2749_s8 = sld [smem:[#allocation18_spill]] (%p800_p5) }
  0x1d   : > { %v808_v1 = vld [vmem:[%s2746_s27] sm:$0x3] }
  0x1e   : > { %v810_v2 = vsel %vm809_vm0, %v808_v1, 0.0  ;;  %v2181_v3 = vld [vmem:[%s2747_s23 + $0x18] sm:$0xff]   ;;  %v2182_v5 = vld [vmem:[%s2747_s23 + $0x10] sm:$0xff]   ;;  %v2183_v6 = vld [vmem:[%s2747_s23 + $0x8] sm:$0xff]  }
  0x1f   : > { %811 = vadd.xlane.f32.xlu0 %v810_v2  ;;  %2056 = vmatpush3.bf16.msra.mxu0 %v2181_v3  ;;  %v2184_v7 = vld [vmem:[%s2747_s23] sm:$0xff]   ;;  %v807_v9 = vld [vmem:[%s2748_s29 + $0x8] sm:$0xff] }
  0x20   : > { %2057 = vmatprep.subr.bf16.mxu0 %v2262_v4  ;;  %v806_v8 = vld [vmem:[%s2748_s29] sm:$0xff]  ;;  %v821_v11 = vsel %vm813_vm3, %v807_v9, 0.0 }
  0x21   : > { %v814_v10 = vsel %vm813_vm3, %v806_v8, 0.0  ;;  %v822_v13 = vrot.slane %v821_v11, 4  ;;  %v1970_v36 = vld [vmem:[%s2749_s8] ss:$0 sm:$0xff] }
  0x22   : > { %v815_v12 = vrot.slane %v814_v10, 4 }
  0x23   : > { %2058 = vmatpush3.bf16.msra.mxu0 %v2182_v5  ;;  %v823_v15 = vadd.f32 %v822_v13, %v821_v11 }
  0x24   : > { %2059 = vmatprep.subr.bf16.mxu0 %v2262_v4  ;;  %v816_v14 = vadd.f32 %v815_v12, %v814_v10 }
  0x25   : > { %v824_v18 = vrot.slane %v823_v15, 2 }
  0x26   : > { %v817_v16 = vrot.slane %v816_v14, 2 }
  0x27   : > { %2060 = vmatpush3.bf16.msra.mxu0 %v2183_v6  ;;  %v825_v20 = vadd.f32 %v824_v18, %v823_v15 }
  0x28   : > { %2061 = vmatprep.subr.bf16.mxu0 %v2262_v4  ;;  %v818_v19 = vadd.f32 %v817_v16, %v816_v14 }
  0x29   : > { %v826_v22 = vrot.slane %v825_v20, 1 }
  0x2a   : > { %v819_v21 = vrot.slane %v818_v19, 1 }
  0x2b   : > { %2062 = vmatpush3.bf16.msra.mxu0 %v2184_v7  ;;  %v827_v24 = vadd.f32 %v826_v22, %v825_v20 }
  0x2c   : > { %v820_v23 = vadd.f32 %v819_v21, %v818_v19 }
  0xa8   : > { %v812_v17 = vpop.xlane.xlu0 %811 }
  0xa9   : > { %2185 = vrcp.f32 %v812_v17 }
  0xb6   : > { %v2186_v25 = vpop.eup %2185 }
  0xb7   : > { %v830_v26 = vrot.slane %v2186_v25, 1  ;;  %v833_v27 = vmul.f32 %v2186_v25, %v820_v23 }
  0xb9   : > { %v834_v28 = vmul.f32 %v830_v26, %v827_v24  ;;  %v835_v29 = vpack.c.bf16 %v833_v27, %v833_v27 }
  0xbb   : > { %v836_v30 = vpack.c.bf16 %v834_v28, %v834_v28  ;;  %v854_v32 = vunpack.c.l.b16 %v835_v29 }
  0xbd   : > { %v855_v31 = vunpack.c.l.b16 %v836_v30 }
  0xbf   : > { %v856_v33 = vrot.slane %v855_v31, 7 }
  0xc1   : > { %v858_v34 = vsel %vm857_vm4, %v856_v33, %v854_v32 }
  0xc2   : > { %v859_v35 = vpack.c.b16 %v858_v34, %v858_v34 }
  0xc4   : > { %2064 = vmatmul.mubr.msk.bf16.vlgmr.msra.gmra.mxu0 %vm813_vm3, %v859_v35 }
 0x184   : > { %v921_v37 = vpop.f32.mrf.mxu0 }
 0x185   : > { %v922_v38 = vadd.f32 %v1970_v36, %v921_v37 }
 0x186   : > { %v2065_v39 = vpop.f32.mrf.mxu0 }
 0x187   : > { %2187 = vtanh.f32 %v922_v38 }
 0x188   : > { %v924_v40 = vpop.f32.mrf.mxu0 }
 0x18a   : > { %v2066_v41 = vpop.f32.mrf.mxu0 }
 0x194   : > { %v2188_v42 = vpop.eup %2187 }
 0x195   : > { %929 = vst.msk [vmem:[#allocation2] sm:$0x3] %vm928_vm5, %v2188_v42 }
 0x196 PF: > { %v2190_v43 = vld [vmem:[%s2708_s9 + $0x8] sm:$0xff]   ;;  %v2264_v44 = vmov 0.0   ;;  %s2750_s26 = sld [smem:[#allocation19_spill]]  ;;  %v2192_v46 = vld [vmem:[%s2708_s9] sm:$0xff]   ;;  %vm2265_vm6 = vmmov 0   ;;  %vm958_vm7 = vcmask 130048   ;;  %v1171_v22 = vlaneseq }
 0x197   : > { %2073 = vmatprep.subr.bf16.mxu1 %v2264_v44  ;;  %2067 = vmatprep.subr.bf16.mxu0 %v2264_v44  ;;  %v2483_v47 = vld [vmem:[%s783_s30] sm:$0x3]  ;;  %vm1021_vm8 = vcmask 261120   ;;  %s2266_s8 = smov 64   ;;  %v2193_v8 = vld [vmem:[%s2711_s12 + $0x8] sm:$0xff]   ;;  %s2267_s29 = smov 96  }
 0x198   : > { %2074 = vmatpush3.bf16.msra.mxu1 %v2190_v43  ;;  %2069 = vmatprep.mubr.msk.bf16.mxu0 %vm2265_vm6, %v2264_v44  ;;  %v945_v49 = vpack.c.bf16 %v2483_v47, %v2483_v47  ;;  %v1979_v52 = vld [vmem:[%s2710_s11] ss:$0 sm:$0xff]  ;;  %s2268_s0 = smov 32   ;;  %v2269_v19 = vmov 0   ;;  %v2270_v20 = vmov 1966171168  }
 0x199   : > { %2075 = vmatprep.subr.bf16.mxu1 %v2264_v44  ;;  %2077 = vmatprep.mubr.msk.bf16.mxu1 %vm2265_vm6, %v2264_v44  ;;  %v1976_v61 = vld [vmem:[%s2709_s10] ss:$0 sm:$0xff]  ;;  %v1169_v21 = vunpack.c.l.s4 %v2270_v20  ;;  %v1172_v24 = vshrl.u32 %v1171_v22, 7  ;;  %s2752_s28 = sld [smem:[#allocation16_spill]]  ;;  %vm1245_vm9 = vcmask 1041409   ;;  %vm1249_vm11 = vcmask 58368  }
 0x19a   : > { %v2194_v10 = vld [vmem:[%s2711_s12] sm:$0xff]   ;;  %2189 = vset.pattern.permute.xlu0 %v2269_v19  ;;  %s2754_s3 = sld [smem:[#allocation14_spill]]  ;;  %vm1286_vm12 = vcmask 64512   ;;  %vm1484_vm13 = vcmask 523264   ;;  %s2271_s5 = smov 112   ;;  %vm1624_vm14 = vcmask 392192  }
 0x19b   : > { %v1170_v23 = vunpack.c.0.s8 %v1169_v21  ;;  %v1984_v25 = vld [vmem:[%s2712_s13] ss:$0 sm:$0xff]  ;;  %v1192_v31 = vsub.s32 0, %v1172_v24  ;;  %v2198_v21 = vld [vmem:[%s2715_s16 + $0x10] sm:$0xff]   ;;  %vm1690_vm15 = vcmask 916480   ;;  %vm1738_vm0 = vcmask 254976  }
 0x19c   : > { %v2191_v45 = vld [vmem:[%s2750_s26] sm:$0xff]   ;;  %2076 = vmatpush3.bf16.msra.mxu1 %v2192_v46  ;;  %s2272_s26 = smov 48   ;;  %vm1741_vm1 = vcmask 1024   ;;  %s2756_s6 = sld [smem:[#allocation20_spill]]  ;;  %vm1814_vm2 = vcmask 1041408  }
 0x19d   : > { %2068 = vmatpush3.bf16.msra.mxu0 %v2191_v45  ;;  %v936_v48 = vld [vmem:[#allocation2] sm:$0x3]  ;;  %2081 = vmatprep.subr.bf16.mxu1 %v2264_v44  ;;  %v2528_v26 = vsub.s32 %v1170_v23, %v1172_v24  ;;  %1743 = vst.msk [vmem:[#allocation5] sm:$0x3] %vm1741_vm1, %v2264_v44  ;;  %1744 = vst.msk [vmem:[#allocation6] sm:$0x3] %vm1741_vm1, %v2264_v44 }
 0x19e   : > { %2094 = vmatprep.subr.mxu0 %v2264_v44  ;;  %v1002_v50 = vpack.c.bf16 %v936_v48, %v936_v48  ;;  %v1988_v43 = vld [vmem:[%s2713_s14] ss:$0 sm:$0xff] }
 0x19f   : > { %s2753_s1 = smov %s2752_s28  ;;  %v1165_v35 = vld [vmem:[%s2752_s28] sm:$0xff]  ;;  %s2755_s28 = sld [smem:[#allocation15_spill]] }
 0x1a0   : > { %2070 = vmatmul.mubr.msk.bf16.vlgmr.msra.gmra.mxu0 %vm958_vm7, %v945_v49  ;;  %2078 = vmatmul.mubr.msk.bf16.vlgmr.msra.gmra.mxu1 %vm1021_vm8, %v1002_v50  ;;  %v1166_v39 = vld [vmem:[%s2753_s1 + $0x8] sm:$0xff]  ;;  %v2196_v20 = vld [vmem:[%s2716_s17] sm:$0xff]  }
 0x1a1   : > { %2096 = vmatprep.mubr.msk.f32.mxu0 %vm2265_vm6, %v2264_v44  ;;  %2085 = vmatprep.mubr.msk.bf16.mxu1 %vm2265_vm6, %v2264_v44 }
 0x1a2   : > { %2082 = vmatpush3.bf16.msra.mxu1 %v2193_v8 }
 0x1a3   : > { %2083 = vmatprep.subr.bf16.mxu1 %v2264_v44 }
 0x1a5   : > { %v1284_v8 = vld [vmem:[%s2755_s28] sm:$0xff] }
 0x1a6   : > { %2084 = vmatpush3.bf16.msra.mxu1 %v2194_v10 }
 0x1a7   : > { %2089 = vmatprep.subr.mxu1 %v2264_v44 }
 0x260   : > { %v996_v51 = vpop.f32.mrf.mxu0  ;;  %v1059_v54 = vpop.f32.mrf.mxu1 }
 0x261   : > { %v1060_v55 = vadd.f32 %v1979_v52, %v1059_v54  ;;  %v997_v62 = vadd.f32 %v1976_v61, %v996_v51  ;;  %v1989_v52 = vld [vmem:[#allocation7] ss:$0 sm:$0xff] }
 0x262   : > { %v2071_v53 = vpop.f32.mrf.mxu0  ;;  %v2079_v57 = vpop.f32.mrf.mxu1 }
 0x263   : > { %1073 = vrot.lane.b32.xlu0 %v1060_v55, %s2266_s8  ;;  %v1065_v63 = vadd.f32 %v1060_v55, %v997_v62  ;;  %v2544_v53 = vand.u32 127, %v1171_v22  ;;  %v2199_v22 = vld [vmem:[%s2715_s16 + $0x8] sm:$0xff]  }
 0x264   : > { %v999_v56 = vpop.f32.mrf.mxu0  ;;  %v1062_v59 = vpop.f32.mrf.mxu1 }
 0x265   : > { %v1983_v0 = vmul.f32 -1.442695, %v1065_v63  ;;  %v1239_v55 = vsub.s32 %v2544_v53, %v1172_v24 }
 0x266   : > { %v2072_v58 = vpop.f32.mrf.mxu0  ;;  %v2080_v60 = vpop.f32.mrf.mxu1 }
 0x267   : > { %2210 = vpow2.f32 %v1983_v0  ;;  %v1231_v58 = vld [vmem:[%s2754_s3] sm:$0x3] }
 0x268   : > { %vm1232_vm10 = vcmp.gt.f32.partialorder %v1231_v58, 0.0 }
 0x274   : > { %v2211_v1 = vpop.eup %2210 }
 0x275   : > { %v1069_v2 = vadd.f32 1.0, %v2211_v1 }
 0x277   : > { %2212 = vrcp.f32 %v1069_v2 }
 0x284   : > { %v2213_v3 = vpop.eup %2212 }
 0x285   : > { %v1083_v12 = vsub.f32 1.0, %v2213_v3 }
 0x2d5   : > { %v1074_v4 = vpop.permute.xlu0 %1073 }
 0x2d6   : > { %v1076_v5 = vmul.f32 %v2213_v3, %v1074_v4 }
 0x2d8   : > { %1078 = vrot.lane.b32.xlu0 %v1076_v5, %s2266_s8 }
 0x34a   : > { %v1079_v6 = vpop.permute.xlu0 %1078 }
 0x34b   : > { %v1081_v7 = vadd.f32 %v1079_v6, %v997_v62 }
 0x34d   : > { %2214 = vtanh.f32 %v1081_v7  ;;  %v1285_v7 = vld [vmem:[%s2755_s28 + $0x8] sm:$0xff] }
 0x34e   : > { %2095 = vmatpush3.msra.mxu0 %v1285_v7 }
 0x34f   : > { %2111 = vmatprep.subr.bf16.mxu0 %v2264_v44 }
 0x35a   : > { %v2215_v9 = vpop.eup %2214 }
 0x35b   : > { %1085 = vrot.lane.b32.xlu1 %v2215_v9, %s2267_s29 }
 0x35f   : > { %1090 = vrot.lane.b32.xlu1 %v936_v48, %s2268_s0 }
 0x3cd   : > { %v1086_v11 = vpop.permute.xlu1 %1085 }
 0x3ce   : > { %v1088_v14 = vmul.f32 %v1086_v11, %v1083_v12 }
 0x3d1   : > { %v1091_v13 = vpop.permute.xlu1 %1090 }
 0x3d2   : > { %v1093_v15 = vmul.f32 %v2213_v3, %v1091_v13  ;;  %v2197_v13 = vld [vmem:[%s2715_s16 + $0x18] sm:$0xff]  }
 0x3d4   : > { %v2514_v16 = vadd.f32 %v1093_v15, %v1088_v14 }
 0x3d6   : > { %v1095_v17 = vpack.c.bf16 %v2514_v16, %v2514_v16 }
 0x3d8   : > { %1108 = vrot.lane.b32.xlu0 %v1095_v17, %s2267_s29  ;;  %v2195_v17 = vld [vmem:[%s2716_s17 + $0x8] sm:$0xff]  }
 0x44a   : > { %v2519_v18 = vpop.permute.xlu0 %1108 }
 0x44b   : > { %2086 = vmatmul.mubr.msk.bf16.vlgmr.msra.gmra.mxu1 %vm1021_vm8, %v2519_v18 }
 0x44c   : > { %2091 = vmatprep.mubr.msk.f32.mxu1 %vm2265_vm6, %v2264_v44  ;;  %2090 = vmatpush3.msra.mxu1 %v1284_v8 }
 0x44d   : > { %2099 = vmatprep.subr.bf16.mxu1 %v2264_v44 }
 0x50b   : > { %v1159_v27 = vpop.f32.mrf.mxu1 }
 0x50c   : > { %v1160_v28 = vadd.f32 %v1984_v25, %v1159_v27 }
 0x50d   : > { %v2087_v29 = vpop.f32.mrf.mxu1 }
 0x50e   : > { %v1174_v30 = vrot.slane %v1160_v28, %v2528_v26 }
 0x50f   : > { %v1162_v32 = vpop.f32.mrf.mxu1 }
 0x510   : > { %v1175_v33 = vcombine.high %v1174_v30, %v1174_v30  ;;  %v1182_v34 = vrot.slane %v1174_v30, %v2528_v26 }
 0x511   : > { %v2088_v36 = vpop.f32.mrf.mxu1 }
 0x512   : > { %v1189_v37 = vrot.slane %v1175_v33, %v2528_v26  ;;  %v1193_v38 = vrot.slane %v1182_v34, %v1192_v31  ;;  %v1998_v34 = vld [vmem:[%s2718_s19] ss:$0 sm:$0xff] }
 0x514   : > { %v1197_v40 = vrot.slane %v1189_v37, %v1192_v31  ;;  %v1200_v41 = vadd.f32 %v1193_v38, %v1165_v35 }
 0x516   : > { %v1201_v42 = vadd.f32 %v1197_v40, %v1166_v39  ;;  %2216 = vtanh.f32 %v1200_v41 }
 0x518   : > { %2218 = vtanh.f32 %v1201_v42  ;;  %v1992_v42 = vld [vmem:[%s2717_s18] ss:$0 sm:$0xff] }
 0x523   : > { %v2217_v45 = vpop.eup %2216 }
 0x524   : > { %v1211_v46 = vmul.f32 %v2217_v45, %v1988_v43 }
 0x525   : > { %v2219_v48 = vpop.eup %2218 }
 0x526   : > { %v1213_v49 = vsel %vm1021_vm8, %v1211_v46, 0.0  ;;  %v1212_v50 = vmul.f32 %v2219_v48, %v1988_v43 }
 0x527   : > { %1214 = vadd.xlane.f32.xlu1 %v1213_v49 }
 0x528   : > { %v1216_v51 = vsel %vm1021_vm8, %v1212_v50, 0.0 }
 0x529   : > { %1217 = vadd.xlane.f32.xlu0 %v1216_v51 }
 0x53f   : > { %1226 = vperm.xlu0 %2189, %v1989_v52  }
 0x5b0   : > { %v1215_v56 = vpop.xlane.xlu1 %1214 }
 0x5b2   : > { %v1218_v54 = vpop.xlane.xlu0 %1217 }
 0x5ba   : > { %v1227_v57 = vpop.permute.xlu0 %1226 }
 0x5bb   : > { %v1229_v59 = vadd.f32 %v1227_v57, %v1215_v56  ;;  %v1230_v60 = vadd.f32 %v1227_v57, %v1218_v54 }
 0x5bd   : > { %v1240_v61 = vrot.slane %v1229_v59, %v1239_v55  ;;  %v1244_v62 = vrot.slane %v1230_v60, %v1239_v55  ;;  %v2201_v60 = vld [vmem:[%s2719_s20 + $0x30] sm:$0xff]  }
 0x5bf   : > { %v1246_v63 = vsel %vm1245_vm9, %v1244_v62, %v1240_v61  ;;  %v2202_v61 = vld [vmem:[%s2719_s20 + $0x28] sm:$0xff]  }
 0x5c0   : > { %v1248_v0 = vsel %vm1232_vm10, %v1246_v63, -1e+30  ;;  %v2203_v63 = vld [vmem:[%s2719_s20 + $0x20] sm:$0xff]  }
 0x5c1   : > { %v1250_v1 = vsel %vm1249_vm11, %v1248_v0, -inf }
 0x5c2   : > { %1251 = vmax.xlane.f32.xlu1 %v1250_v1  ;;  %v2205_v1 = vld [vmem:[%s2719_s20 + $0x10] sm:$0xff]  }
 0x64b   : > { %v1252_v2 = vpop.xlane.xlu1 %1251 }
 0x64c   : > { %v1253_v3 = vsub.f32 %v1248_v0, %v1252_v2  ;;  %v2204_v0 = vld [vmem:[%s2719_s20 + $0x18] sm:$0xff]   ;;  %v2206_v2 = vld [vmem:[%s2719_s20 + $0x8] sm:$0xff]  }
 0x64e   : > { %v1254_v4 = vmul.f32 1.442695, %v1253_v3  ;;  %v2207_v3 = vld [vmem:[%s2719_s20] sm:$0xff]  }
 0x650   : > { %2220 = vpow2.f32 %v1254_v4 }
 0x65d   : > { %v2221_v5 = vpop.eup %2220 }
 0x65e   : > { %v1256_v6 = vsel %vm1249_vm11, %v2221_v5, 0.0 }
 0x65f   : > { %1257 = vadd.xlane.f32.xlu1 %v1256_v6 }
 0x6e8   : > { %v1258_v9 = vpop.xlane.xlu1 %1257 }
 0x6e9   : > { %2222 = vrcp.f32 %v1258_v9 }
 0x6f6   : > { %v2223_v10 = vpop.eup %2222 }
 0x6f7   : > { %v1260_v11 = vmul.f32 %v2223_v10, %v2221_v5 }
 0x6f9   : > { %v1268_v12 = vrot.slane %v1260_v11, %v2528_v26 }
 0x6fb   : > { %v1276_v14 = vrot.slane %v1268_v12, %v2528_v26  ;;  %v1269_v15 = vcombine.high %v1268_v12, %v1268_v12 }
 0x6fd   : > { %2092 = vmatmul.mubr.msk.f32.vlgmr.msra.gmra.mxu1 %vm1286_vm12, %v1276_v14  ;;  %v1283_v19 = vrot.slane %v1269_v15, %v2528_v26  ;;  %v2209_v14 = vld [vmem:[%s2721_s22] sm:$0xff]  }
 0x6fe   : > { %2100 = vmatpush3.bf16.msra.mxu1 %v2197_v13  ;;  %2107 = vmatprep.mubr.msk.bf16.mxu1 %vm2265_vm6, %v2264_v44 }
 0x6ff   : > { %2097 = vmatmul.mubr.msk.f32.vlgmr.msra.gmra.mxu0 %vm1286_vm12, %v1283_v19  ;;  %2101 = vmatprep.subr.bf16.mxu1 %v2264_v44 }
 0x700   : > { %2112 = vmatpush3.bf16.msra.mxu0 %v2195_v17  ;;  %2115 = vmatprep.mubr.msk.bf16.mxu0 %vm2265_vm6, %v2264_v44 }
 0x701   : > { %2113 = vmatprep.subr.bf16.mxu0 %v2264_v44 }
 0x702   : > { %2102 = vmatpush3.bf16.msra.mxu1 %v2198_v21 }
 0x703   : > { %2103 = vmatprep.subr.bf16.mxu1 %v2264_v44 }
 0x704   : > { %2114 = vmatpush3.bf16.msra.mxu0 %v2196_v20 }
 0x705   : > { %2119 = vmatprep.subr.bf16.mxu0 %v2264_v44 }
 0x706   : > { %2104 = vmatpush3.bf16.msra.mxu1 %v2199_v22 }
 0x707   : > { %2116 = vmatmul.mubr.msk.bf16.vlgmr.msra.gmra.mxu0 %vm1021_vm8, %v2519_v18  ;;  %2105 = vmatprep.subr.bf16.mxu1 %v2264_v44  ;;  %v2200_v18 = vld [vmem:[%s2715_s16] sm:$0xff]  }
 0x708   : > { %2133 = vmatprep.mubr.msk.bf16.mxu0 %vm2265_vm6, %v2264_v44  ;;  %2120 = vmatpush3.bf16.msra.mxu0 %v2201_v60 }
 0x709   : > { %2121 = vmatprep.subr.bf16.mxu0 %v2264_v44 }
 0x70a   : > { %2106 = vmatpush3.bf16.msra.mxu1 %v2200_v18 }
 0x70b   : > { %2137 = vmatprep.subr.bf16.mxu1 %v2264_v44 }
 0x70c   : > { %2122 = vmatpush3.bf16.msra.mxu0 %v2202_v61 }
 0x70d   : > { %2123 = vmatprep.subr.bf16.mxu0 %v2264_v44 }
 0x710   : > { %2124 = vmatpush3.bf16.msra.mxu0 %v2203_v63 }
 0x711   : > { %2125 = vmatprep.subr.bf16.mxu0 %v2264_v44 }
 0x714   : > { %2126 = vmatpush3.bf16.msra.mxu0 %v2204_v0  ;;  %v1865_v0 = vld [vmem:[%s2723_s24] sm:$0x3] }
 0x715   : > { %2127 = vmatprep.subr.bf16.mxu0 %v2264_v44 }
 0x718   : > { %2128 = vmatpush3.bf16.msra.mxu0 %v2205_v1 }
 0x719   : > { %2129 = vmatprep.subr.bf16.mxu0 %v2264_v44 }
 0x71c   : > { %2130 = vmatpush3.bf16.msra.mxu0 %v2206_v2 }
 0x71d   : > { %2131 = vmatprep.subr.bf16.mxu0 %v2264_v44 }
 0x720   : > { %2132 = vmatpush3.bf16.msra.mxu0 %v2207_v3 }
 0x7bd   : > { %v1355_v23 = vpop.f32.mrf.mxu1 }
 0x7be   : > { %v1445_v26 = vpack.c.bf16 %v1355_v23, %v1355_v23 }
 0x7bf   : > { %v2093_v24 = vpop.f32.mrf.mxu1  ;;  %v1427_v25 = vpop.f32.mrf.mxu0 }
 0x7c0   : > { %v1446_v27 = vpack.c.bf16 %v1427_v25, %v1427_v25  ;;  %v1618_v28 = vrot.slane %v1427_v25, 7  ;;  %v1455_v32 = vunpack.c.l.b16 %v1445_v26  ;;  %v2273_v24 = vmov -1e+30   ;;  %v2012_v25 = vld [vmem:[%s2756_s6] ss:$0 sm:$0xff] }
 0x7c1   : > { %v2098_v29 = vpop.f32.mrf.mxu0  ;;  %1742 = vst.msk [vmem:[#allocation4] sm:$0x3] %vm1741_vm1, %v2273_v24 }
 0x7c2   : > { %v1456_v30 = vunpack.c.l.b16 %v1446_v27  ;;  %v2595_v31 = vsel %vm1245_vm9, %v1618_v28, %v1355_v23 }
 0x7c4   : > { %v1457_v33 = vrot.slane %v1456_v30, 7 }
 0x7c6   : > { %v1458_v35 = vsel %vm1245_vm9, %v1457_v33, %v1455_v32 }
 0x7c7   : > { %v1459_v36 = vpack.c.b16 %v1458_v35, %v1458_v35  ;;  %v1580_v37 = vpop.f32.mrf.mxu0 }
 0x7c8   : > { %v1581_v38 = vadd.f32 %v1998_v34, %v1580_v37  ;;  %v1818_v32 = vld [vmem:[#allocation4] sm:$0x3] }
 0x7c9   : > { %v2117_v39 = vpop.f32.mrf.mxu0  ;;  %2108 = vmatmul.mubr.msk.bf16.vlgmr.msra.gmra.mxu1 %vm1484_vm13, %v1459_v36 }
 0x7ca   : > { %1594 = vrot.lane.b32.xlu1 %v1581_v38, %s2266_s8  ;;  %2141 = vmatprep.mubr.msk.bf16.mxu1 %vm2265_vm6, %v2264_v44 }
 0x7cb   : > { %v1583_v40 = vpop.f32.mrf.mxu0 }
 0x7cd   : > { %v2118_v41 = vpop.f32.mrf.mxu0 }
 0x83c   : > { %v1595_v56 = vpop.permute.xlu1 %1594 }
 0x889   : > { %v1522_v43 = vpop.f32.mrf.mxu1 }
 0x88a   : > { %v1523_v45 = vadd.f32 %v1992_v42, %v1522_v43 }
 0x88b   : > { %v2109_v46 = vpop.f32.mrf.mxu1 }
 0x88c   : > { %v1586_v48 = vadd.f32 %v1581_v38, %v1523_v45  ;;  %v1850_v46 = vld [vmem:[#allocation6] sm:$0x3] }
 0x88d   : > { %v1525_v49 = vpop.f32.mrf.mxu1 }
 0x88e   : > { %v2002_v50 = vmul.f32 -1.442695, %v1586_v48 }
 0x88f   : > { %v2110_v51 = vpop.f32.mrf.mxu1 }
 0x890   : > { %2224 = vpow2.f32 %v2002_v50  ;;  %v1820_v51 = vld [vmem:[#allocation5] sm:$0x3] }
 0x89d   : > { %v2225_v52 = vpop.eup %2224 }
 0x89e   : > { %v1590_v54 = vadd.f32 1.0, %v2225_v52 }
 0x8a0   : > { %2226 = vrcp.f32 %v1590_v54 }
 0x8ad   : > { %v2227_v55 = vpop.eup %2226 }
 0x8ae   : > { %v1597_v57 = vmul.f32 %v2227_v55, %v1595_v56  ;;  %v1604_v4 = vsub.f32 1.0, %v2227_v55  ;;  %v1610_v6 = vmul.f32 %v2227_v55, %v2514_v16  ;;  %v2208_v16 = vld [vmem:[%s2721_s22 + $0x8] sm:$0xff]  }
 0x8af   : > { %2138 = vmatpush3.bf16.msra.mxu1 %v2208_v16 }
 0x8b0   : > { %1599 = vrot.lane.b32.xlu1 %v1597_v57, %s2266_s8  ;;  %2139 = vmatprep.subr.bf16.mxu1 %v2264_v44  ;;  %v1845_v44 = vld [vmem:[%s787_s4] sm:$0x3] }
 0x8b3   : > { %2140 = vmatpush3.bf16.msra.mxu1 %v2209_v14 }
 0x922   : > { %v1600_v58 = vpop.permute.xlu1 %1599 }
 0x923   : > { %v1602_v59 = vadd.f32 %v1600_v58, %v1523_v45 }
 0x925   : > { %2228 = vtanh.f32 %v1602_v59 }
 0x932   : > { %v2229_v62 = vpop.eup %2228 }
 0x933   : > { %1606 = vrot.lane.b32.xlu1 %v2229_v62, %s2267_s29  ;;  %v1868_v62 = vld [vmem:[%s791_s15] sm:$0x3] }
 0x9a5   : > { %v1607_v5 = vpop.permute.xlu1 %1606 }
 0x9a6   : > { %v1609_v7 = vmul.f32 %v1607_v5, %v1604_v4 }
 0x9a8   : > { %v2637_v8 = vadd.f32 %v1610_v6, %v1609_v7 }
 0x9aa   : > { %1613 = vrot.lane.b32.xlu1 %v2637_v8, %s2271_s5 }
 0x9ae   : > { %1620 = vrot.lane.b32.xlu1 %v2595_v31, %s2272_s26 }
 0xa1c   : > { %v1614_v9 = vpop.permute.xlu1 %1613 }
 0xa1d   : > { %v1623_v10 = vsel %vm958_vm7, %v2483_v47, %v1614_v9  ;;  %v2003_v47 = vld [vmem:[%s2720_s21] ss:$0 sm:$0xff] }
 0xa20   : > { %v1621_v11 = vpop.permute.xlu1 %1620 }
 0xa21   : > { %v1625_v12 = vsel %vm1624_vm14, %v1623_v10, %v1621_v11 }
 0xa22   : > { %v1626_v13 = vpack.c.bf16 %v1625_v12, %v1625_v12 }
 0xa24   : > { %2134 = vmatmul.mubr.msk.bf16.vlgmr.msra.gmra.mxu0 %vm1690_vm15, %v1626_v13 }
 0xae4   : > { %v1728_v15 = vpop.f32.mrf.mxu0 }
 0xae5   : > { %v1729_v17 = vadd.f32 %v2003_v47, %v1728_v15 }
 0xae6   : > { %v2135_v19 = vpop.f32.mrf.mxu0 }
 0xae7   : > { %2230 = vtanh.f32 %v1729_v17 }
 0xae8   : > { %v1731_v20 = vpop.f32.mrf.mxu0 }
 0xaea   : > { %v2136_v21 = vpop.f32.mrf.mxu0 }
 0xaf4   : > { %v2231_v22 = vpop.eup %2230 }
 0xaf5   : > { %1740 = vst.msk [vmem:[#allocation3] sm:$0x3] %vm1738_vm0, %v2231_v22 }
 0xafc   : > { %v1745_v18 = vld [vmem:[#allocation3] sm:$0x3] }
 0xafd   : > { %v1746_v23 = vpack.c.bf16 %v1745_v18, %v1745_v18 }
 0xaff   : > { %2142 = vmatmul.mubr.msk.bf16.vlgmr.msra.gmra.mxu1 %vm1021_vm8, %v1746_v23 }
 0xbbf   : > { %v1808_v26 = vpop.f32.mrf.mxu1 }
 0xbc0   : > { %v1809_v27 = vadd.f32 %v2012_v25, %v1808_v26 }
 0xbc1   : > { %v2143_v28 = vpop.f32.mrf.mxu1 }
 0xbc2   : > { %v1815_v29 = vsel %vm1814_vm2, %v1809_v27, -inf }
 0xbc3   : > { %1816 = vmax.xlane.f32.xlu1 %v1815_v29  ;;  %v1811_v30 = vpop.f32.mrf.mxu1 }
 0xbc5   : > { %v2144_v31 = vpop.f32.mrf.mxu1 }
 0xc4c   : > { %v1817_v33 = vpop.xlane.xlu1 %1816 }
 0xc4d   : > { %v1819_v34 = vmax.f32 %v1818_v32, %v1817_v33 }
 0xc4f   : > { %v1821_v35 = vsub.f32 %v1818_v32, %v1819_v34  ;;  %1839 = vst.msk [vmem:[#allocation4] sm:$0x3] %vm1741_vm1, %v1819_v34  ;;  %1827 = vperm.xlu0 %2189, %v1819_v34  }
 0xc51   : > { %v1822_v45 = vmul.f32 1.442695, %v1821_v35 }
 0xc53   : > { %1847 = vperm.xlu0 %2189, %v1845_v44  }
 0xc56   : > { %v1860_v59 = vld [vmem:[#allocation4] sm:$0x3] }
 0xcca   : > { %v1828_v36 = vpop.permute.xlu0 %1827 }
 0xccb   : > { %v1830_v37 = vsub.f32 %v1809_v27, %v1828_v36 }
 0xccd   : > { %v1831_v38 = vmul.f32 1.442695, %v1830_v37 }
 0xcce   : > { %v1848_v39 = vpop.permute.xlu0 %1847 }
 0xccf   : > { %2232 = vpow2.f32 %v1831_v38  ;;  %vm1849_vm3 = vcmp.eq.s32.totalorder %v2544_v53, %v1848_v39 }
 0xcd0   : > { %v1851_v40 = vsel %vm1849_vm3, %v1809_v27, 0.0  ;;  %2234 = vpow2.f32 %v1822_v45 }
 0xcd1   : > { %v1852_v41 = vsel %vm1814_vm2, %v1851_v40, 0.0 }
 0xcd2   : > { %1853 = vadd.xlane.f32.xlu1 %v1852_v41 }
 0xcdc   : > { %v2233_v42 = vpop.eup %2232 }
 0xcdd   : > { %v1833_v43 = vsel %vm1814_vm2, %v2233_v42, 0.0  ;;  %v2235_v50 = vpop.eup %2234 }
 0xcde   : > { %1834 = vadd.xlane.f32.xlu0 %v1833_v43  ;;  %v1824_v52 = vmul.f32 %v2235_v50, %v1820_v51 }
 0xce3   : > { %1735 = vrot.lane.b32.xlu1 %v2637_v8, %s2267_s29 }
 0xd5b   : > { %v1854_v48 = vpop.xlane.xlu1 %1853 }
 0xd5c   : > { %v1855_v49 = vadd.f32 %v1854_v48, %v1850_v46 }
 0xd5e   : > { %1856 = vst.msk [vmem:[#allocation6] sm:$0x3] %vm1741_vm1, %v1855_v49 }
 0xd5f   : > { %v1736_v53 = vpop.permute.xlu1 %1735 }
 0xd60   : > { %1739 = vst.msk [vmem:[#allocation2] sm:$0x3] %vm1738_vm0, %v1736_v53 }
 0xd65   : > { %v1866_v61 = vld [vmem:[#allocation6] sm:$0x3] }
 0xd67   : > { %v1835_v54 = vpop.xlane.xlu0 %1834 }
 0xd68   : > { %v1836_v55 = vadd.f32 %v1835_v54, %v1824_v52 }
 0xd6a   : > { %1838 = vst.msk [vmem:[#allocation5] sm:$0x3] %vm1741_vm1, %v1836_v55 }
 0xd71   : > { %v1861_v56 = vld [vmem:[#allocation5] sm:$0x3] }
 0xd72   : > { %2236 = vlog2.f32 %v1861_v56 }
 0xd7f   : > { %v2237_v57 = vpop.eup %2236 }
 0xd80   : > { %v1863_v58 = vmul.f32 0.6931472, %v2237_v57 }
 0xd82   : > { %v1864_v60 = vadd.f32 %v1863_v58, %v1860_v59 }
 0xd84   : > { %v1867_v63 = vsub.f32 %v1864_v60, %v1866_v61 }
 0xd86   : > { %v1869_v1 = vmul.f32 %v1868_v62, %v1867_v63 }
 0xd88   : > { %v1870_v2 = vadd.f32 %v1869_v1, %v1865_v0 }
 0xd8a   : > { %1871 = vst.msk [vmem:[%s2723_s24] sm:$0x3] %vm1741_vm1, %v1870_v2 }
 0xd8b PF: > { %s2759_s25 = sld [smem:[#allocation9_spill]] }
 0xd8c   : > { %s2760_s27 = sld [smem:[#allocation8_spill]] }
 0xd8d   : > { %s2761_s28 = sld [smem:[#allocation10_spill]] }
 0xd91   : > { %s36_s6 = sadd.s32 1, %s2759_s25  }
 0xd92   : > { %p33_p6 = scmp.ge.s32.totalorder %s36_s6, 9  }
 0xd94   :  { %35 = sbr.rel (!%p33_p6) target bundleno = 11 (0xb), region = 166 }

</bundles_post_ra>
